<compile_context>
chip_gen: v7x
topology: tpu7x:2x2x1
jax: 0.10.0
libtpu: 0.0.40
codegen_flags: <defaults>
</compile_context>

<pallas_src>
import jax
import jax.numpy as jnp
from jax.experimental import pallas as pl
from jax.experimental.pallas import tpu as pltpu


def _round_up(n, m):
    return ((n + m - 1) // m) * m


def simple_rnn_kernel(x_ref, wih_ref, whh_ref, brnn_ref, wh_ref, bh_ref,
                      out_ref):
    """One batch block of the forward pass.

    x_ref    : (T, Bb, F)   time-major input block
    wih_ref  : (F, H)       input->hidden weights (pre-transposed)
    whh_ref  : (H, H)       hidden->hidden weights (pre-transposed)
    brnn_ref : (1, H)       b_ih + b_hh
    wh_ref   : (H, Cp)      fused dense head + output weights (lane-padded)
    bh_ref   : (1, Cp)      fused bias (-1e30 in padding lanes)
    out_ref  : (Bb, Cp)     softmax probabilities (padding lanes == 0)
    """
    T, Bb, _ = x_ref.shape
    H = whh_ref.shape[0]

    # Loop-invariant reads hoisted out of the recurrence.
    wih = wih_ref[...]
    whh = whh_ref[...]
    brnn = brnn_ref[...]

    # Hoisted input projection, kept entirely as values (no VMEM scratch).
    # Each pre[t] is independent of h, so the LLO scheduler overlaps these
    # MXU ops with the serial tanh chain below.
    pre = [jnp.dot(x_ref[t], wih, preferred_element_type=jnp.float32) + brnn
           for t in range(T)]

    # Elman recurrence, statically unrolled:
    #   h_t = tanh(pre[t] + h_{t-1} @ W_hh^T)
    h = jnp.zeros((Bb, H), jnp.float32)
    for t in range(T):
        h = jnp.tanh(pre[t] +
                     jnp.dot(h, whh, preferred_element_type=jnp.float32))

    # Fused affine dense head + output layer (Dropout is identity in eval).
    logits = (jnp.dot(h, wh_ref[...], preferred_element_type=jnp.float32)
              + bh_ref[...])

    # Softmax over the (lane-padded) class dim; pad lanes carry -1e30 bias
    # so their probability is exactly 0.  Exact reciprocal (rows sum to 1).
    m = jnp.max(logits, axis=1, keepdims=True)
    e = jnp.exp(logits - m)
    denom = jnp.sum(e, axis=1, keepdims=True)
    out_ref[...] = e * pl.reciprocal(denom, approx=False)


def prepare_params(params, lane_pad=128):
    """One-time, parameter-only preprocessing.  Cache the result; it must not
    be recomputed per forward call (that was a dispatch-level cost)."""
    w_ih, w_hh, b_ih, b_hh, dense_w, dense_b, w_out, b_out = params
    H = w_hh.shape[0]
    C = w_out.shape[0]
    c_pad = _round_up(max(C, lane_pad), lane_pad)

    wih_t = jnp.asarray(w_ih.T, jnp.float32)                    # (F, H)
    whh_t = jnp.asarray(w_hh.T, jnp.float32)                    # (H, H)
    brnn = (b_ih + b_hh).reshape(1, H).astype(jnp.float32)      # (1, H)

    # Fold the purely-affine dense head (Linear + identity Dropout stack, no
    # activations in the reference module) and the output Linear into one
    # affine map  y -> y @ w_head + b_head.
    w_head = jnp.eye(H, dtype=jnp.float32)
    b_head = jnp.zeros((H,), jnp.float32)
    for i in range(dense_w.shape[0]):
        w_head = w_head @ dense_w[i].T
        b_head = b_head @ dense_w[i].T + dense_b[i]
    w_head = w_head @ w_out.T                                    # (H, C)
    b_head = b_head @ w_out.T + b_out                            # (C,)

    # Lane-dense padding of the class dim: zero weights + very negative bias
    # in the pad lanes -> probability exactly 0 there, unmasked 128-wide store.
    w_pad = jnp.zeros((H, c_pad), jnp.float32).at[:, :C].set(w_head)
    b_pad = jnp.full((1, c_pad), -1e30, jnp.float32).at[0, :C].set(b_head)

    return dict(wih=wih_t, whh=whh_t, brnn=brnn,
                w_head=w_pad, b_head=b_pad, n_classes=int(C))


def simple_rnn_forward(x, prep, *, block_batch=128):
    """x: (B, T, 6) batch_first float32.  Returns (B, n_classes) softmax probs."""
    B, T, F = x.shape
    H = prep["whh"].shape[0]
    C = prep["n_classes"]
    c_pad = prep["w_head"].shape[1]

    # Batch block: multiple of 8 sublanes; 128-256 recommended in production.
    b_blk = min(_round_up(B, 8), _round_up(block_batch, 8))
    b_pad = _round_up(B, b_blk)

    # Time-major layout so each per-step tile is a clean (Bb, H) sublane slab.
    x_tm = jnp.transpose(x, (1, 0, 2))                           # (T, B, F)
    if b_pad != B:
        x_tm = jnp.pad(x_tm, ((0, 0), (0, b_pad - B), (0, 0)))

    out = pl.pallas_call(
        simple_rnn_kernel,
        out_shape=jax.ShapeDtypeStruct((b_pad, c_pad), jnp.float32),
        grid=(b_pad // b_blk,),
        in_specs=[
            pl.BlockSpec((T, b_blk, F), lambda i: (0, i, 0)),
            pl.BlockSpec((F, H), lambda i: (0, 0)),       # weights: constant
            pl.BlockSpec((H, H), lambda i: (0, 0)),       # index_maps -> no
            pl.BlockSpec((1, H), lambda i: (0, 0)),       # per-block re-fetch
            pl.BlockSpec((H, c_pad), lambda i: (0, 0)),
            pl.BlockSpec((1, c_pad), lambda i: (0, 0)),
        ],
        out_specs=pl.BlockSpec((b_blk, c_pad), lambda i: (i, 0)),
        compiler_params=pltpu.CompilerParams(
            dimension_semantics=("parallel",)),
    )(x_tm, prep["wih"], prep["whh"], prep["brnn"],
      prep["w_head"], prep["b_head"])
    return out[:B, :C]


def reference_forward(x, params):
    """Pure-JAX reference of the same forward pass (unfused dense head)."""
    (w_ih, w_hh, b_ih, b_hh, dense_w, dense_b, w_out, b_out) = params
    B, T, F = x.shape
    H = w_hh.shape[0]
    h = jnp.zeros((B, H), jnp.float32)
    for t in range(T):
        h = jnp.tanh(x[:, t, :] @ w_ih.T + b_ih + h @ w_hh.T + b_hh)
    y = h
    for i in range(dense_w.shape[0]):
        y = y @ dense_w[i].T + dense_b[i]
    logits = y @ w_out.T + b_out
    return jax.nn.softmax(logits, axis=1)


def init_params(key, input_size=6, rnn_units=32, dense_units=32,
                dense_num=2, n_classes=6):
    """Deterministic synthetic parameters (PyTorch parameter shapes)."""
    ks = jax.random.split(key, 8)
    s = 1.0 / jnp.sqrt(rnn_units)
    w_ih = jax.random.uniform(ks[0], (rnn_units, input_size), jnp.float32, -s, s)
    w_hh = jax.random.uniform(ks[1], (rnn_units, rnn_units), jnp.float32, -s, s)
    b_ih = jax.random.uniform(ks[2], (rnn_units,), jnp.float32, -s, s)
    b_hh = jax.random.uniform(ks[3], (rnn_units,), jnp.float32, -s, s)
    dense_w = jax.random.uniform(ks[4], (dense_num, dense_units, rnn_units),
                                 jnp.float32, -s, s)
    dense_b = jax.random.uniform(ks[5], (dense_num, dense_units),
                                 jnp.float32, -s, s)
    w_out = jax.random.uniform(ks[6], (n_classes, dense_units), jnp.float32, -s, s)
    b_out = jax.random.uniform(ks[7], (n_classes,), jnp.float32, -s, s)
    return (w_ih, w_hh, b_ih, b_hh, dense_w, dense_b, w_out, b_out)


if __name__ == "__main__":
    key = jax.random.PRNGKey(0)
    k_x, k_p = jax.random.split(key)

    B, T, F = 64, 16, 6           # batch, window_length, 6 sensor channels
    rnn_units = 32
    dense_units = 32
    dense_num = 2
    n_classes = 6

    x = jax.random.normal(k_x, (B, T, F), jnp.float32)
    params = init_params(k_p, input_size=F, rnn_units=rnn_units,
                         dense_units=dense_units, dense_num=dense_num,
                         n_classes=n_classes)

    # Parameter-only preprocessing done once (cached); jit the per-call path.
    prep = prepare_params(params)
    fwd = jax.jit(lambda xx: simple_rnn_forward(xx, prep, block_batch=32))

    out = jax.block_until_ready(fwd(x))
    ref = jax.block_until_ready(reference_forward(x, params))

    assert out.shape == (B, n_classes)
    assert jnp.allclose(jnp.sum(out, axis=1), 1.0, atol=1e-4)
    assert jnp.allclose(out, ref, atol=5e-4, rtol=5e-4)

    print("KERNEL_OK")
</pallas_src>

<mosaic_0001>
module attributes {stable_mosaic.version = 11 : i64} {
  func.func @simple_rnn_kernel(%arg0: i32, %arg1: memref<16x32x6xf32, #tpu.memory_space<vmem>>, %arg2: memref<6x32xf32, #tpu.memory_space<vmem>>, %arg3: memref<32x32xf32, #tpu.memory_space<vmem>>, %arg4: memref<1x32xf32, #tpu.memory_space<vmem>>, %arg5: memref<32x128xf32, #tpu.memory_space<vmem>>, %arg6: memref<1x128xf32, #tpu.memory_space<vmem>>, %arg7: memref<32x128xf32, #tpu.memory_space<vmem>>) attributes {dimension_semantics = [#tpu.dimension_semantics<parallel>], iteration_bounds = array<i64: 2>, scalar_prefetch = 0 : i64, scratch_operands = 0 : i64, tpu.core_type = #tpu.core_type<tc>, window_params = [{transform_indices = @transform_0, window_bounds = array<i64: 16, 32, 6>}, {pipeline_mode = #tpu.pipeline_mode<synchronous>, transform_indices = @transform_1, window_bounds = array<i64: 6, 32>}, {pipeline_mode = #tpu.pipeline_mode<synchronous>, transform_indices = @transform_2, window_bounds = array<i64: 32, 32>}, {pipeline_mode = #tpu.pipeline_mode<synchronous>, transform_indices = @transform_3, window_bounds = array<i64: 1, 32>}, {pipeline_mode = #tpu.pipeline_mode<synchronous>, transform_indices = @transform_4, window_bounds = array<i64: 32, 128>}, {pipeline_mode = #tpu.pipeline_mode<synchronous>, transform_indices = @transform_5, window_bounds = array<i64: 1, 128>}, {transform_indices = @transform_6, window_bounds = array<i64: 32, 128>}]} {
    %c0 = arith.constant 0 : index
    %c0_0 = arith.constant 0 : index
    %0 = vector.load %arg2[%c0, %c0_0] : memref<6x32xf32, #tpu.memory_space<vmem>>, vector<6x32xf32>
    %c0_1 = arith.constant 0 : index
    %c0_2 = arith.constant 0 : index
    %1 = vector.load %arg3[%c0_1, %c0_2] : memref<32x32xf32, #tpu.memory_space<vmem>>, vector<32x32xf32>
    %c0_3 = arith.constant 0 : index
    %c0_4 = arith.constant 0 : index
    %2 = vector.load %arg4[%c0_3, %c0_4] : memref<1x32xf32, #tpu.memory_space<vmem>>, vector<1x32xf32>
    %c0_5 = arith.constant 0 : index
    %c0_6 = arith.constant 0 : index
    %c0_7 = arith.constant 0 : index
    %3 = vector.load %arg1[%c0_5, %c0_6, %c0_7] : memref<16x32x6xf32, #tpu.memory_space<vmem>>, vector<1x32x6xf32>
    %4 = vector.shape_cast %3 : vector<1x32x6xf32> to vector<32x6xf32>
    %cst = arith.constant dense<0.000000e+00> : vector<32x32xf32>
    %5 = tpu.matmul %4, %0, %cst {dimension_numbers = #tpu.dot_dimension_numbers<[1], [0], [0], [1], [0, 0, 1, 1], [], []>} : vector<32x6xf32>, vector<6x32xf32>, vector<32x32xf32> -> vector<32x32xf32>
    %6 = vector.broadcast %2 : vector<1x32xf32> to vector<32x32xf32>
    %7 = arith.addf %5, %6 : vector<32x32xf32>
    %c1 = arith.constant 1 : index
    %c0_8 = arith.constant 0 : index
    %c0_9 = arith.constant 0 : index
    %8 = vector.load %arg1[%c1, %c0_8, %c0_9] : memref<16x32x6xf32, #tpu.memory_space<vmem>>, vector<1x32x6xf32>
    %9 = vector.shape_cast %8 : vector<1x32x6xf32> to vector<32x6xf32>
    %cst_10 = arith.constant dense<0.000000e+00> : vector<32x32xf32>
    %10 = tpu.matmul %9, %0, %cst_10 {dimension_numbers = #tpu.dot_dimension_numbers<[1], [0], [0], [1], [0, 0, 1, 1], [], []>} : vector<32x6xf32>, vector<6x32xf32>, vector<32x32xf32> -> vector<32x32xf32>
    %11 = vector.broadcast %2 : vector<1x32xf32> to vector<32x32xf32>
    %12 = arith.addf %10, %11 : vector<32x32xf32>
    %c2 = arith.constant 2 : index
    %c0_11 = arith.constant 0 : index
    %c0_12 = arith.constant 0 : index
    %13 = vector.load %arg1[%c2, %c0_11, %c0_12] : memref<16x32x6xf32, #tpu.memory_space<vmem>>, vector<1x32x6xf32>
    %14 = vector.shape_cast %13 : vector<1x32x6xf32> to vector<32x6xf32>
    %cst_13 = arith.constant dense<0.000000e+00> : vector<32x32xf32>
    %15 = tpu.matmul %14, %0, %cst_13 {dimension_numbers = #tpu.dot_dimension_numbers<[1], [0], [0], [1], [0, 0, 1, 1], [], []>} : vector<32x6xf32>, vector<6x32xf32>, vector<32x32xf32> -> vector<32x32xf32>
    %16 = vector.broadcast %2 : vector<1x32xf32> to vector<32x32xf32>
    %17 = arith.addf %15, %16 : vector<32x32xf32>
    %c3 = arith.constant 3 : index
    %c0_14 = arith.constant 0 : index
    %c0_15 = arith.constant 0 : index
    %18 = vector.load %arg1[%c3, %c0_14, %c0_15] : memref<16x32x6xf32, #tpu.memory_space<vmem>>, vector<1x32x6xf32>
    %19 = vector.shape_cast %18 : vector<1x32x6xf32> to vector<32x6xf32>
    %cst_16 = arith.constant dense<0.000000e+00> : vector<32x32xf32>
    %20 = tpu.matmul %19, %0, %cst_16 {dimension_numbers = #tpu.dot_dimension_numbers<[1], [0], [0], [1], [0, 0, 1, 1], [], []>} : vector<32x6xf32>, vector<6x32xf32>, vector<32x32xf32> -> vector<32x32xf32>
    %21 = vector.broadcast %2 : vector<1x32xf32> to vector<32x32xf32>
    %22 = arith.addf %20, %21 : vector<32x32xf32>
    %c4 = arith.constant 4 : index
    %c0_17 = arith.constant 0 : index
    %c0_18 = arith.constant 0 : index
    %23 = vector.load %arg1[%c4, %c0_17, %c0_18] : memref<16x32x6xf32, #tpu.memory_space<vmem>>, vector<1x32x6xf32>
    %24 = vector.shape_cast %23 : vector<1x32x6xf32> to vector<32x6xf32>
    %cst_19 = arith.constant dense<0.000000e+00> : vector<32x32xf32>
    %25 = tpu.matmul %24, %0, %cst_19 {dimension_numbers = #tpu.dot_dimension_numbers<[1], [0], [0], [1], [0, 0, 1, 1], [], []>} : vector<32x6xf32>, vector<6x32xf32>, vector<32x32xf32> -> vector<32x32xf32>
    %26 = vector.broadcast %2 : vector<1x32xf32> to vector<32x32xf32>
    %27 = arith.addf %25, %26 : vector<32x32xf32>
    %c5 = arith.constant 5 : index
    %c0_20 = arith.constant 0 : index
    %c0_21 = arith.constant 0 : index
    %28 = vector.load %arg1[%c5, %c0_20, %c0_21] : memref<16x32x6xf32, #tpu.memory_space<vmem>>, vector<1x32x6xf32>
    %29 = vector.shape_cast %28 : vector<1x32x6xf32> to vector<32x6xf32>
    %cst_22 = arith.constant dense<0.000000e+00> : vector<32x32xf32>
    %30 = tpu.matmul %29, %0, %cst_22 {dimension_numbers = #tpu.dot_dimension_numbers<[1], [0], [0], [1], [0, 0, 1, 1], [], []>} : vector<32x6xf32>, vector<6x32xf32>, vector<32x32xf32> -> vector<32x32xf32>
    %31 = vector.broadcast %2 : vector<1x32xf32> to vector<32x32xf32>
    %32 = arith.addf %30, %31 : vector<32x32xf32>
    %c6 = arith.constant 6 : index
    %c0_23 = arith.constant 0 : index
    %c0_24 = arith.constant 0 : index
    %33 = vector.load %arg1[%c6, %c0_23, %c0_24] : memref<16x32x6xf32, #tpu.memory_space<vmem>>, vector<1x32x6xf32>
    %34 = vector.shape_cast %33 : vector<1x32x6xf32> to vector<32x6xf32>
    %cst_25 = arith.constant dense<0.000000e+00> : vector<32x32xf32>
    %35 = tpu.matmul %34, %0, %cst_25 {dimension_numbers = #tpu.dot_dimension_numbers<[1], [0], [0], [1], [0, 0, 1, 1], [], []>} : vector<32x6xf32>, vector<6x32xf32>, vector<32x32xf32> -> vector<32x32xf32>
    %36 = vector.broadcast %2 : vector<1x32xf32> to vector<32x32xf32>
    %37 = arith.addf %35, %36 : vector<32x32xf32>
    %c7 = arith.constant 7 : index
    %c0_26 = arith.constant 0 : index
    %c0_27 = arith.constant 0 : index
    %38 = vector.load %arg1[%c7, %c0_26, %c0_27] : memref<16x32x6xf32, #tpu.memory_space<vmem>>, vector<1x32x6xf32>
    %39 = vector.shape_cast %38 : vector<1x32x6xf32> to vector<32x6xf32>
    %cst_28 = arith.constant dense<0.000000e+00> : vector<32x32xf32>
    %40 = tpu.matmul %39, %0, %cst_28 {dimension_numbers = #tpu.dot_dimension_numbers<[1], [0], [0], [1], [0, 0, 1, 1], [], []>} : vector<32x6xf32>, vector<6x32xf32>, vector<32x32xf32> -> vector<32x32xf32>
    %41 = vector.broadcast %2 : vector<1x32xf32> to vector<32x32xf32>
    %42 = arith.addf %40, %41 : vector<32x32xf32>
    %c8 = arith.constant 8 : index
    %c0_29 = arith.constant 0 : index
    %c0_30 = arith.constant 0 : index
    %43 = vector.load %arg1[%c8, %c0_29, %c0_30] : memref<16x32x6xf32, #tpu.memory_space<vmem>>, vector<1x32x6xf32>
    %44 = vector.shape_cast %43 : vector<1x32x6xf32> to vector<32x6xf32>
    %cst_31 = arith.constant dense<0.000000e+00> : vector<32x32xf32>
    %45 = tpu.matmul %44, %0, %cst_31 {dimension_numbers = #tpu.dot_dimension_numbers<[1], [0], [0], [1], [0, 0, 1, 1], [], []>} : vector<32x6xf32>, vector<6x32xf32>, vector<32x32xf32> -> vector<32x32xf32>
    %46 = vector.broadcast %2 : vector<1x32xf32> to vector<32x32xf32>
    %47 = arith.addf %45, %46 : vector<32x32xf32>
    %c9 = arith.constant 9 : index
    %c0_32 = arith.constant 0 : index
    %c0_33 = arith.constant 0 : index
    %48 = vector.load %arg1[%c9, %c0_32, %c0_33] : memref<16x32x6xf32, #tpu.memory_space<vmem>>, vector<1x32x6xf32>
    %49 = vector.shape_cast %48 : vector<1x32x6xf32> to vector<32x6xf32>
    %cst_34 = arith.constant dense<0.000000e+00> : vector<32x32xf32>
    %50 = tpu.matmul %49, %0, %cst_34 {dimension_numbers = #tpu.dot_dimension_numbers<[1], [0], [0], [1], [0, 0, 1, 1], [], []>} : vector<32x6xf32>, vector<6x32xf32>, vector<32x32xf32> -> vector<32x32xf32>
    %51 = vector.broadcast %2 : vector<1x32xf32> to vector<32x32xf32>
    %52 = arith.addf %50, %51 : vector<32x32xf32>
    %c10 = arith.constant 10 : index
    %c0_35 = arith.constant 0 : index
    %c0_36 = arith.constant 0 : index
    %53 = vector.load %arg1[%c10, %c0_35, %c0_36] : memref<16x32x6xf32, #tpu.memory_space<vmem>>, vector<1x32x6xf32>
    %54 = vector.shape_cast %53 : vector<1x32x6xf32> to vector<32x6xf32>
    %cst_37 = arith.constant dense<0.000000e+00> : vector<32x32xf32>
    %55 = tpu.matmul %54, %0, %cst_37 {dimension_numbers = #tpu.dot_dimension_numbers<[1], [0], [0], [1], [0, 0, 1, 1], [], []>} : vector<32x6xf32>, vector<6x32xf32>, vector<32x32xf32> -> vector<32x32xf32>
    %56 = vector.broadcast %2 : vector<1x32xf32> to vector<32x32xf32>
    %57 = arith.addf %55, %56 : vector<32x32xf32>
    %c11 = arith.constant 11 : index
    %c0_38 = arith.constant 0 : index
    %c0_39 = arith.constant 0 : index
    %58 = vector.load %arg1[%c11, %c0_38, %c0_39] : memref<16x32x6xf32, #tpu.memory_space<vmem>>, vector<1x32x6xf32>
    %59 = vector.shape_cast %58 : vector<1x32x6xf32> to vector<32x6xf32>
    %cst_40 = arith.constant dense<0.000000e+00> : vector<32x32xf32>
    %60 = tpu.matmul %59, %0, %cst_40 {dimension_numbers = #tpu.dot_dimension_numbers<[1], [0], [0], [1], [0, 0, 1, 1], [], []>} : vector<32x6xf32>, vector<6x32xf32>, vector<32x32xf32> -> vector<32x32xf32>
    %61 = vector.broadcast %2 : vector<1x32xf32> to vector<32x32xf32>
    %62 = arith.addf %60, %61 : vector<32x32xf32>
    %c12 = arith.constant 12 : index
    %c0_41 = arith.constant 0 : index
    %c0_42 = arith.constant 0 : index
    %63 = vector.load %arg1[%c12, %c0_41, %c0_42] : memref<16x32x6xf32, #tpu.memory_space<vmem>>, vector<1x32x6xf32>
    %64 = vector.shape_cast %63 : vector<1x32x6xf32> to vector<32x6xf32>
    %cst_43 = arith.constant dense<0.000000e+00> : vector<32x32xf32>
    %65 = tpu.matmul %64, %0, %cst_43 {dimension_numbers = #tpu.dot_dimension_numbers<[1], [0], [0], [1], [0, 0, 1, 1], [], []>} : vector<32x6xf32>, vector<6x32xf32>, vector<32x32xf32> -> vector<32x32xf32>
    %66 = vector.broadcast %2 : vector<1x32xf32> to vector<32x32xf32>
    %67 = arith.addf %65, %66 : vector<32x32xf32>
    %c13 = arith.constant 13 : index
    %c0_44 = arith.constant 0 : index
    %c0_45 = arith.constant 0 : index
    %68 = vector.load %arg1[%c13, %c0_44, %c0_45] : memref<16x32x6xf32, #tpu.memory_space<vmem>>, vector<1x32x6xf32>
    %69 = vector.shape_cast %68 : vector<1x32x6xf32> to vector<32x6xf32>
    %cst_46 = arith.constant dense<0.000000e+00> : vector<32x32xf32>
    %70 = tpu.matmul %69, %0, %cst_46 {dimension_numbers = #tpu.dot_dimension_numbers<[1], [0], [0], [1], [0, 0, 1, 1], [], []>} : vector<32x6xf32>, vector<6x32xf32>, vector<32x32xf32> -> vector<32x32xf32>
    %71 = vector.broadcast %2 : vector<1x32xf32> to vector<32x32xf32>
    %72 = arith.addf %70, %71 : vector<32x32xf32>
    %c14 = arith.constant 14 : index
    %c0_47 = arith.constant 0 : index
    %c0_48 = arith.constant 0 : index
    %73 = vector.load %arg1[%c14, %c0_47, %c0_48] : memref<16x32x6xf32, #tpu.memory_space<vmem>>, vector<1x32x6xf32>
    %74 = vector.shape_cast %73 : vector<1x32x6xf32> to vector<32x6xf32>
    %cst_49 = arith.constant dense<0.000000e+00> : vector<32x32xf32>
    %75 = tpu.matmul %74, %0, %cst_49 {dimension_numbers = #tpu.dot_dimension_numbers<[1], [0], [0], [1], [0, 0, 1, 1], [], []>} : vector<32x6xf32>, vector<6x32xf32>, vector<32x32xf32> -> vector<32x32xf32>
    %76 = vector.broadcast %2 : vector<1x32xf32> to vector<32x32xf32>
    %77 = arith.addf %75, %76 : vector<32x32xf32>
    %c15 = arith.constant 15 : index
    %c0_50 = arith.constant 0 : index
    %c0_51 = arith.constant 0 : index
    %78 = vector.load %arg1[%c15, %c0_50, %c0_51] : memref<16x32x6xf32, #tpu.memory_space<vmem>>, vector<1x32x6xf32>
    %79 = vector.shape_cast %78 : vector<1x32x6xf32> to vector<32x6xf32>
    %cst_52 = arith.constant dense<0.000000e+00> : vector<32x32xf32>
    %80 = tpu.matmul %79, %0, %cst_52 {dimension_numbers = #tpu.dot_dimension_numbers<[1], [0], [0], [1], [0, 0, 1, 1], [], []>} : vector<32x6xf32>, vector<6x32xf32>, vector<32x32xf32> -> vector<32x32xf32>
    %81 = vector.broadcast %2 : vector<1x32xf32> to vector<32x32xf32>
    %82 = arith.addf %80, %81 : vector<32x32xf32>
    %cst_53 = arith.constant 0.000000e+00 : f32
    %83 = vector.broadcast %cst_53 : f32 to vector<32x32xf32>
    %cst_54 = arith.constant dense<0.000000e+00> : vector<32x32xf32>
    %84 = tpu.matmul %83, %1, %cst_54 {dimension_numbers = #tpu.dot_dimension_numbers<[1], [0], [0], [1], [0, 0, 1, 1], [], []>} : vector<32x32xf32>, vector<32x32xf32>, vector<32x32xf32> -> vector<32x32xf32>
    %85 = arith.addf %7, %84 : vector<32x32xf32>
    %86 = math.tanh %85 : vector<32x32xf32>
    %cst_55 = arith.constant dense<0.000000e+00> : vector<32x32xf32>
    %87 = tpu.matmul %86, %1, %cst_55 {dimension_numbers = #tpu.dot_dimension_numbers<[1], [0], [0], [1], [0, 0, 1, 1], [], []>} : vector<32x32xf32>, vector<32x32xf32>, vector<32x32xf32> -> vector<32x32xf32>
    %88 = arith.addf %12, %87 : vector<32x32xf32>
    %89 = math.tanh %88 : vector<32x32xf32>
    %cst_56 = arith.constant dense<0.000000e+00> : vector<32x32xf32>
    %90 = tpu.matmul %89, %1, %cst_56 {dimension_numbers = #tpu.dot_dimension_numbers<[1], [0], [0], [1], [0, 0, 1, 1], [], []>} : vector<32x32xf32>, vector<32x32xf32>, vector<32x32xf32> -> vector<32x32xf32>
    %91 = arith.addf %17, %90 : vector<32x32xf32>
    %92 = math.tanh %91 : vector<32x32xf32>
    %cst_57 = arith.constant dense<0.000000e+00> : vector<32x32xf32>
    %93 = tpu.matmul %92, %1, %cst_57 {dimension_numbers = #tpu.dot_dimension_numbers<[1], [0], [0], [1], [0, 0, 1, 1], [], []>} : vector<32x32xf32>, vector<32x32xf32>, vector<32x32xf32> -> vector<32x32xf32>
    %94 = arith.addf %22, %93 : vector<32x32xf32>
    %95 = math.tanh %94 : vector<32x32xf32>
    %cst_58 = arith.constant dense<0.000000e+00> : vector<32x32xf32>
    %96 = tpu.matmul %95, %1, %cst_58 {dimension_numbers = #tpu.dot_dimension_numbers<[1], [0], [0], [1], [0, 0, 1, 1], [], []>} : vector<32x32xf32>, vector<32x32xf32>, vector<32x32xf32> -> vector<32x32xf32>
    %97 = arith.addf %27, %96 : vector<32x32xf32>
    %98 = math.tanh %97 : vector<32x32xf32>
    %cst_59 = arith.constant dense<0.000000e+00> : vector<32x32xf32>
    %99 = tpu.matmul %98, %1, %cst_59 {dimension_numbers = #tpu.dot_dimension_numbers<[1], [0], [0], [1], [0, 0, 1, 1], [], []>} : vector<32x32xf32>, vector<32x32xf32>, vector<32x32xf32> -> vector<32x32xf32>
    %100 = arith.addf %32, %99 : vector<32x32xf32>
    %101 = math.tanh %100 : vector<32x32xf32>
    %cst_60 = arith.constant dense<0.000000e+00> : vector<32x32xf32>
    %102 = tpu.matmul %101, %1, %cst_60 {dimension_numbers = #tpu.dot_dimension_numbers<[1], [0], [0], [1], [0, 0, 1, 1], [], []>} : vector<32x32xf32>, vector<32x32xf32>, vector<32x32xf32> -> vector<32x32xf32>
    %103 = arith.addf %37, %102 : vector<32x32xf32>
    %104 = math.tanh %103 : vector<32x32xf32>
    %cst_61 = arith.constant dense<0.000000e+00> : vector<32x32xf32>
    %105 = tpu.matmul %104, %1, %cst_61 {dimension_numbers = #tpu.dot_dimension_numbers<[1], [0], [0], [1], [0, 0, 1, 1], [], []>} : vector<32x32xf32>, vector<32x32xf32>, vector<32x32xf32> -> vector<32x32xf32>
    %106 = arith.addf %42, %105 : vector<32x32xf32>
    %107 = math.tanh %106 : vector<32x32xf32>
    %cst_62 = arith.constant dense<0.000000e+00> : vector<32x32xf32>
    %108 = tpu.matmul %107, %1, %cst_62 {dimension_numbers = #tpu.dot_dimension_numbers<[1], [0], [0], [1], [0, 0, 1, 1], [], []>} : vector<32x32xf32>, vector<32x32xf32>, vector<32x32xf32> -> vector<32x32xf32>
    %109 = arith.addf %47, %108 : vector<32x32xf32>
    %110 = math.tanh %109 : vector<32x32xf32>
    %cst_63 = arith.constant dense<0.000000e+00> : vector<32x32xf32>
    %111 = tpu.matmul %110, %1, %cst_63 {dimension_numbers = #tpu.dot_dimension_numbers<[1], [0], [0], [1], [0, 0, 1, 1], [], []>} : vector<32x32xf32>, vector<32x32xf32>, vector<32x32xf32> -> vector<32x32xf32>
    %112 = arith.addf %52, %111 : vector<32x32xf32>
    %113 = math.tanh %112 : vector<32x32xf32>
    %cst_64 = arith.constant dense<0.000000e+00> : vector<32x32xf32>
    %114 = tpu.matmul %113, %1, %cst_64 {dimension_numbers = #tpu.dot_dimension_numbers<[1], [0], [0], [1], [0, 0, 1, 1], [], []>} : vector<32x32xf32>, vector<32x32xf32>, vector<32x32xf32> -> vector<32x32xf32>
    %115 = arith.addf %57, %114 : vector<32x32xf32>
    %116 = math.tanh %115 : vector<32x32xf32>
    %cst_65 = arith.constant dense<0.000000e+00> : vector<32x32xf32>
    %117 = tpu.matmul %116, %1, %cst_65 {dimension_numbers = #tpu.dot_dimension_numbers<[1], [0], [0], [1], [0, 0, 1, 1], [], []>} : vector<32x32xf32>, vector<32x32xf32>, vector<32x32xf32> -> vector<32x32xf32>
    %118 = arith.addf %62, %117 : vector<32x32xf32>
    %119 = math.tanh %118 : vector<32x32xf32>
    %cst_66 = arith.constant dense<0.000000e+00> : vector<32x32xf32>
    %120 = tpu.matmul %119, %1, %cst_66 {dimension_numbers = #tpu.dot_dimension_numbers<[1], [0], [0], [1], [0, 0, 1, 1], [], []>} : vector<32x32xf32>, vector<32x32xf32>, vector<32x32xf32> -> vector<32x32xf32>
    %121 = arith.addf %67, %120 : vector<32x32xf32>
    %122 = math.tanh %121 : vector<32x32xf32>
    %cst_67 = arith.constant dense<0.000000e+00> : vector<32x32xf32>
    %123 = tpu.matmul %122, %1, %cst_67 {dimension_numbers = #tpu.dot_dimension_numbers<[1], [0], [0], [1], [0, 0, 1, 1], [], []>} : vector<32x32xf32>, vector<32x32xf32>, vector<32x32xf32> -> vector<32x32xf32>
    %124 = arith.addf %72, %123 : vector<32x32xf32>
    %125 = math.tanh %124 : vector<32x32xf32>
    %cst_68 = arith.constant dense<0.000000e+00> : vector<32x32xf32>
    %126 = tpu.matmul %125, %1, %cst_68 {dimension_numbers = #tpu.dot_dimension_numbers<[1], [0], [0], [1], [0, 0, 1, 1], [], []>} : vector<32x32xf32>, vector<32x32xf32>, vector<32x32xf32> -> vector<32x32xf32>
    %127 = arith.addf %77, %126 : vector<32x32xf32>
    %128 = math.tanh %127 : vector<32x32xf32>
    %cst_69 = arith.constant dense<0.000000e+00> : vector<32x32xf32>
    %129 = tpu.matmul %128, %1, %cst_69 {dimension_numbers = #tpu.dot_dimension_numbers<[1], [0], [0], [1], [0, 0, 1, 1], [], []>} : vector<32x32xf32>, vector<32x32xf32>, vector<32x32xf32> -> vector<32x32xf32>
    %130 = arith.addf %82, %129 : vector<32x32xf32>
    %131 = math.tanh %130 : vector<32x32xf32>
    %c0_70 = arith.constant 0 : index
    %c0_71 = arith.constant 0 : index
    %132 = vector.load %arg5[%c0_70, %c0_71] : memref<32x128xf32, #tpu.memory_space<vmem>>, vector<32x128xf32>
    %cst_72 = arith.constant dense<0.000000e+00> : vector<32x128xf32>
    %133 = tpu.matmul %131, %132, %cst_72 {dimension_numbers = #tpu.dot_dimension_numbers<[1], [0], [0], [1], [0, 0, 1, 1], [], []>} : vector<32x32xf32>, vector<32x128xf32>, vector<32x128xf32> -> vector<32x128xf32>
    %c0_73 = arith.constant 0 : index
    %c0_74 = arith.constant 0 : index
    %134 = vector.load %arg6[%c0_73, %c0_74] : memref<1x128xf32, #tpu.memory_space<vmem>>, vector<1x128xf32>
    %135 = vector.broadcast %134 : vector<1x128xf32> to vector<32x128xf32>
    %136 = arith.addf %133, %135 : vector<32x128xf32>
    %cst_75 = arith.constant dense<0xFF800000> : vector<32xf32>
    %137 = vector.multi_reduction <maximumf>, %136, %cst_75 [1] : vector<32x128xf32> to vector<32xf32>
    %138 = vector.shape_cast %137 : vector<32xf32> to vector<32x1xf32>
    %139 = vector.broadcast %138 : vector<32x1xf32> to vector<32x128xf32>
    %140 = arith.subf %136, %139 : vector<32x128xf32>
    %141 = math.exp %140 : vector<32x128xf32>
    %cst_76 = arith.constant dense<0.000000e+00> : vector<32xf32>
    %142 = vector.multi_reduction <add>, %141, %cst_76 [1] : vector<32x128xf32> to vector<32xf32>
    %143 = vector.shape_cast %142 : vector<32xf32> to vector<32x1xf32>
    %144 = tpu.reciprocal %143 : vector<32x1xf32> -> vector<32x1xf32>
    %145 = vector.broadcast %144 : vector<32x1xf32> to vector<32x128xf32>
    %146 = arith.mulf %141, %145 : vector<32x128xf32>
    %c0_77 = arith.constant 0 : index
    %c0_78 = arith.constant 0 : index
    %147 = vector.load %arg7[%c0_77, %c0_78] : memref<32x128xf32, #tpu.memory_space<vmem>>, vector<32x128xf32>
    tpu.vector_store %arg7[%c0_77, %c0_78], %146 {strides = array<i32>} : memref<32x128xf32, #tpu.memory_space<vmem>>, vector<32x128xf32>,
    return
  }
  func.func @transform_0(%arg0: i32) -> (i32, i32, i32) {
    %c0_i32 = arith.constant 0 : i32
    %c0_i32_0 = arith.constant 0 : i32
    %c0_i32_1 = arith.constant 0 : i32
    return %c0_i32, %arg0, %c0_i32_0 : i32, i32, i32
  }
  func.func @transform_1(%arg0: i32) -> (i32, i32) {
    %c0_i32 = arith.constant 0 : i32
    %c0_i32_0 = arith.constant 0 : i32
    %c0_i32_1 = arith.constant 0 : i32
    return %c0_i32, %c0_i32_0 : i32, i32
  }
  func.func @transform_2(%arg0: i32) -> (i32, i32) {
    %c0_i32 = arith.constant 0 : i32
    %c0_i32_0 = arith.constant 0 : i32
    %c0_i32_1 = arith.constant 0 : i32
    return %c0_i32, %c0_i32_0 : i32, i32
  }
  func.func @transform_3(%arg0: i32) -> (i32, i32) {
    %c0_i32 = arith.constant 0 : i32
    %c0_i32_0 = arith.constant 0 : i32
    %c0_i32_1 = arith.constant 0 : i32
    return %c0_i32, %c0_i32_0 : i32, i32
  }
  func.func @transform_4(%arg0: i32) -> (i32, i32) {
    %c0_i32 = arith.constant 0 : i32
    %c0_i32_0 = arith.constant 0 : i32
    %c0_i32_1 = arith.constant 0 : i32
    return %c0_i32, %c0_i32_0 : i32, i32
  }
  func.func @transform_5(%arg0: i32) -> (i32, i32) {
    %c0_i32 = arith.constant 0 : i32
    %c0_i32_0 = arith.constant 0 : i32
    %c0_i32_1 = arith.constant 0 : i32
    return %c0_i32, %c0_i32_0 : i32, i32
  }
  func.func @transform_6(%arg0: i32) -> (i32, i32) {
    %c0_i32 = arith.constant 0 : i32
    %c0_i32_0 = arith.constant 0 : i32
    return %arg0, %c0_i32 : i32, i32
  }
}

</mosaic_0001>

<bundles_post_ra>
// kernel: _lambda_.1
= control target key start
LH: loop header
LB: loop body
LE: loop exit
PB: predicated region body
PF: predicated region fallthrough
CT: control target
= control target key end

     0   :  { %s5368_s21 = smov 0   ;;  %s5370_s22 = smov 0   ;;  %s5983_s0 = inlined_call_operand.vmem [shape: f32[16,64,6], index: 0, kind: input, shape index: {}]   ;;  %s5984_s1 = inlined_call_operand.vmem [shape: f32[6,32], index: 1, kind: input, shape index: {}]   ;;  %s5985_s2 = inlined_call_operand.vmem [shape: f32[32,32], index: 2, kind: input, shape index: {}]   ;;  %s5986_s3 = inlined_call_operand.vmem [shape: f32[1,32], index: 3, kind: input, shape index: {}]   ;;  %s5987_s4 = inlined_call_operand.vmem [shape: f32[32,128], index: 4, kind: input, shape index: {}]   ;;  %s5988_s5 = inlined_call_operand.vmem [shape: f32[1,128], index: 5, kind: input, shape index: {}]   ;;  %s5989_s6 = inlined_call_operand.vmem [shape: f32[64,128], index: 6, kind: output, shape index: {}]  }
   0x1   :  { %s5372_s23 = smov 0  }
   0x2 LB: > { %s4071_s24 = sadd.s32 4294967295, %s5330_s23   ;;  %s5385_s25 = sadd.s32 1, %s5330_s23   ;;  %s5330_s23 = sphi %s5372_s23, %s5992_s23   ;;  %s5326_s22 = sphi %s5370_s22, %s5991_s22   ;;  %s5322_s21 = sphi %s5368_s21, %s5990_s21  }
   0x3   : > { %s20_s26 = ssub.s32 %s5330_s23, %s5385_s25  ;;  %s23_s27 = sadd.s32 1, %s5326_s22 }
   0x4   : > { %p21_p0 = scmp.eq.s32.totalorder %s20_s26, 0  ;;  %p30_p1 = scmp.ne.s32.totalorder %s5326_s22, %s5322_s21 }
   0x5   : > { %p31_p2 = scmp.eq.s32.totalorder %s5330_s23, 0  ;;  %p4074_p4 = scmp.ge.s32.totalorder %s5330_s23, 2 }
   0x6   : > { %s5394_s28 = scalar_select %p21_p0, %s5326_s22, %s23_s27  }
   0x7   : > { %p32_p3 = por %p31_p2, %p30_p1  ;;  %202 = sbr.rel (%p4074_p4) target bundleno = 50 (0x32), region = 36 }
   0xe   : > { %205 = sbr.rel (!%p32_p3) target bundleno = 50 (0x32), region = 40  ;;  %s207_s29 = sand.u32 (%p32_p3), 1, %s5326_s22  }
   0xf   : > { %s4290_s30 = sshll.u32 (%p32_p3), %s5330_s23, 5  ;;  %s4075_s7 = sshll.u32 (%p32_p3), %s207_s29, 9 }
  0x10   : > { %s5402_s10 = scalar_lea.vmem (%p32_p3), %s5983_s0, %s4290_s30  ;;  %s5407_s11 = scalar_lea.vmem (%p32_p3), [#allocation2], %s4075_s7 }
  0x11   : > { %v366_v0 = vld [vmem:[%s5402_s10] sm:$0xff] (%p32_p3)  ;;  %v368_v1 = vld [vmem:[%s5402_s10 + $0x8] sm:$0xff] (%p32_p3)  ;;  %v370_v2 = vld [vmem:[%s5402_s10 + $0x10] sm:$0xff] (%p32_p3) }
  0x12   : > { %367 = vst [vmem:[%s5407_s11] sm:$0xff] (%p32_p3), %v366_v0  ;;  %369 = vst [vmem:[%s5407_s11 + $0x8] sm:$0xff] (%p32_p3), %v368_v1  ;;  %v372_v3 = vld [vmem:[%s5402_s10 + $0x18] sm:$0xff] (%p32_p3)  ;;  %v374_v4 = vld [vmem:[%s5402_s10 + $0x40] sm:$0xff] (%p32_p3) }
  0x13   : > { %371 = vst [vmem:[%s5407_s11 + $0x10] sm:$0xff] (%p32_p3), %v370_v2  ;;  %v376_v5 = vld [vmem:[%s5402_s10 + $0x48] sm:$0xff] (%p32_p3)  ;;  %373 = vst [vmem:[%s5407_s11 + $0x18] sm:$0xff] (%p32_p3), %v372_v3  ;;  %v378_v6 = vld [vmem:[%s5402_s10 + $0x50] sm:$0xff] (%p32_p3) }
  0x14   : > { %375 = vst [vmem:[%s5407_s11 + $0x20] sm:$0xff] (%p32_p3), %v374_v4  ;;  %377 = vst [vmem:[%s5407_s11 + $0x28] sm:$0xff] (%p32_p3), %v376_v5  ;;  %v380_v7 = vld [vmem:[%s5402_s10 + $0x58] sm:$0xff] (%p32_p3)  ;;  %v382_v8 = vld [vmem:[%s5402_s10 + $0x80] sm:$0xff] (%p32_p3) }
  0x15   : > { %379 = vst [vmem:[%s5407_s11 + $0x30] sm:$0xff] %v378_v6  ;;  %381 = vst [vmem:[%s5407_s11 + $0x38] sm:$0xff] %v380_v7  ;;  %v384_v9 = vld [vmem:[%s5402_s10 + $0x88] sm:$0xff]  ;;  %v386_v10 = vld [vmem:[%s5402_s10 + $0x90] sm:$0xff] }
  0x16   : > { %383 = vst [vmem:[%s5407_s11 + $0x40] sm:$0xff] %v382_v8  ;;  %v388_v11 = vld [vmem:[%s5402_s10 + $0x98] sm:$0xff]  ;;  %385 = vst [vmem:[%s5407_s11 + $0x48] sm:$0xff] %v384_v9  ;;  %v390_v12 = vld [vmem:[%s5402_s10 + $0xc0] sm:$0xff] }
  0x17   : > { %387 = vst [vmem:[%s5407_s11 + $0x50] sm:$0xff] %v386_v10  ;;  %389 = vst [vmem:[%s5407_s11 + $0x58] sm:$0xff] %v388_v11  ;;  %v392_v13 = vld [vmem:[%s5402_s10 + $0xc8] sm:$0xff]  ;;  %v394_v14 = vld [vmem:[%s5402_s10 + $0xd0] sm:$0xff] }
  0x18   : > { %391 = vst [vmem:[%s5407_s11 + $0x60] sm:$0xff] %v390_v12  ;;  %393 = vst [vmem:[%s5407_s11 + $0x68] sm:$0xff] %v392_v13  ;;  %v396_v15 = vld [vmem:[%s5402_s10 + $0xd8] sm:$0xff]  ;;  %v398_v16 = vld [vmem:[%s5402_s10 + $0x100] sm:$0xff] }
  0x19   : > { %395 = vst [vmem:[%s5407_s11 + $0x70] sm:$0xff] %v394_v14  ;;  %v400_v17 = vld [vmem:[%s5402_s10 + $0x108] sm:$0xff]  ;;  %397 = vst [vmem:[%s5407_s11 + $0x78] sm:$0xff] %v396_v15  ;;  %v402_v18 = vld [vmem:[%s5402_s10 + $0x110] sm:$0xff] }
  0x1a   : > { %399 = vst [vmem:[%s5407_s11 + $0x80] sm:$0xff] %v398_v16  ;;  %401 = vst [vmem:[%s5407_s11 + $0x88] sm:$0xff] %v400_v17  ;;  %v404_v19 = vld [vmem:[%s5402_s10 + $0x118] sm:$0xff]  ;;  %v406_v20 = vld [vmem:[%s5402_s10 + $0x140] sm:$0xff] }
  0x1b   : > { %403 = vst [vmem:[%s5407_s11 + $0x90] sm:$0xff] %v402_v18  ;;  %405 = vst [vmem:[%s5407_s11 + $0x98] sm:$0xff] %v404_v19  ;;  %v408_v21 = vld [vmem:[%s5402_s10 + $0x148] sm:$0xff]  ;;  %v410_v22 = vld [vmem:[%s5402_s10 + $0x150] sm:$0xff] }
  0x1c   : > { %407 = vst [vmem:[%s5407_s11 + $0xa0] sm:$0xff] %v406_v20  ;;  %v412_v23 = vld [vmem:[%s5402_s10 + $0x158] sm:$0xff]  ;;  %409 = vst [vmem:[%s5407_s11 + $0xa8] sm:$0xff] %v408_v21  ;;  %v414_v24 = vld [vmem:[%s5402_s10 + $0x180] sm:$0xff] }
  0x1d   : > { %411 = vst [vmem:[%s5407_s11 + $0xb0] sm:$0xff] %v410_v22  ;;  %413 = vst [vmem:[%s5407_s11 + $0xb8] sm:$0xff] %v412_v23  ;;  %v416_v25 = vld [vmem:[%s5402_s10 + $0x188] sm:$0xff]  ;;  %v418_v26 = vld [vmem:[%s5402_s10 + $0x190] sm:$0xff] }
  0x1e   : > { %415 = vst [vmem:[%s5407_s11 + $0xc0] sm:$0xff] %v414_v24  ;;  %417 = vst [vmem:[%s5407_s11 + $0xc8] sm:$0xff] %v416_v25  ;;  %v420_v27 = vld [vmem:[%s5402_s10 + $0x198] sm:$0xff]  ;;  %v422_v28 = vld [vmem:[%s5402_s10 + $0x1c0] sm:$0xff] }
  0x1f   : > { %419 = vst [vmem:[%s5407_s11 + $0xd0] sm:$0xff] %v418_v26  ;;  %v424_v29 = vld [vmem:[%s5402_s10 + $0x1c8] sm:$0xff]  ;;  %421 = vst [vmem:[%s5407_s11 + $0xd8] sm:$0xff] %v420_v27  ;;  %v426_v30 = vld [vmem:[%s5402_s10 + $0x1d0] sm:$0xff] }
  0x20   : > { %423 = vst [vmem:[%s5407_s11 + $0xe0] sm:$0xff] %v422_v28  ;;  %425 = vst [vmem:[%s5407_s11 + $0xe8] sm:$0xff] %v424_v29  ;;  %v428_v31 = vld [vmem:[%s5402_s10 + $0x1d8] sm:$0xff]  ;;  %v430_v32 = vld [vmem:[%s5402_s10 + $0x200] sm:$0xff] }
  0x21   : > { %427 = vst [vmem:[%s5407_s11 + $0xf0] sm:$0xff] %v426_v30  ;;  %429 = vst [vmem:[%s5407_s11 + $0xf8] sm:$0xff] %v428_v31  ;;  %v432_v33 = vld [vmem:[%s5402_s10 + $0x208] sm:$0xff]  ;;  %v434_v34 = vld [vmem:[%s5402_s10 + $0x210] sm:$0xff] }
  0x22   : > { %431 = vst [vmem:[%s5407_s11 + $0x100] sm:$0xff] %v430_v32  ;;  %v436_v35 = vld [vmem:[%s5402_s10 + $0x218] sm:$0xff]  ;;  %433 = vst [vmem:[%s5407_s11 + $0x108] sm:$0xff] %v432_v33  ;;  %v438_v36 = vld [vmem:[%s5402_s10 + $0x240] sm:$0xff] }
  0x23   : > { %435 = vst [vmem:[%s5407_s11 + $0x110] sm:$0xff] %v434_v34  ;;  %437 = vst [vmem:[%s5407_s11 + $0x118] sm:$0xff] %v436_v35  ;;  %v440_v37 = vld [vmem:[%s5402_s10 + $0x248] sm:$0xff]  ;;  %v442_v38 = vld [vmem:[%s5402_s10 + $0x250] sm:$0xff] }
  0x24   : > { %439 = vst [vmem:[%s5407_s11 + $0x120] sm:$0xff] %v438_v36  ;;  %441 = vst [vmem:[%s5407_s11 + $0x128] sm:$0xff] %v440_v37  ;;  %v444_v39 = vld [vmem:[%s5402_s10 + $0x258] sm:$0xff]  ;;  %v446_v40 = vld [vmem:[%s5402_s10 + $0x280] sm:$0xff] }
  0x25   : > { %443 = vst [vmem:[%s5407_s11 + $0x130] sm:$0xff] %v442_v38  ;;  %v448_v41 = vld [vmem:[%s5402_s10 + $0x288] sm:$0xff]  ;;  %445 = vst [vmem:[%s5407_s11 + $0x138] sm:$0xff] %v444_v39  ;;  %v450_v42 = vld [vmem:[%s5402_s10 + $0x290] sm:$0xff] }
  0x26   : > { %447 = vst [vmem:[%s5407_s11 + $0x140] sm:$0xff] %v446_v40  ;;  %449 = vst [vmem:[%s5407_s11 + $0x148] sm:$0xff] %v448_v41  ;;  %v452_v43 = vld [vmem:[%s5402_s10 + $0x298] sm:$0xff]  ;;  %v454_v44 = vld [vmem:[%s5402_s10 + $0x2c0] sm:$0xff] }
  0x27   : > { %451 = vst [vmem:[%s5407_s11 + $0x150] sm:$0xff] %v450_v42  ;;  %453 = vst [vmem:[%s5407_s11 + $0x158] sm:$0xff] %v452_v43  ;;  %v456_v45 = vld [vmem:[%s5402_s10 + $0x2c8] sm:$0xff]  ;;  %v458_v46 = vld [vmem:[%s5402_s10 + $0x2d0] sm:$0xff] }
  0x28   : > { %455 = vst [vmem:[%s5407_s11 + $0x160] sm:$0xff] %v454_v44  ;;  %v460_v47 = vld [vmem:[%s5402_s10 + $0x2d8] sm:$0xff]  ;;  %457 = vst [vmem:[%s5407_s11 + $0x168] sm:$0xff] %v456_v45  ;;  %v462_v48 = vld [vmem:[%s5402_s10 + $0x300] sm:$0xff] }
  0x29   : > { %459 = vst [vmem:[%s5407_s11 + $0x170] sm:$0xff] %v458_v46  ;;  %461 = vst [vmem:[%s5407_s11 + $0x178] sm:$0xff] %v460_v47  ;;  %v464_v49 = vld [vmem:[%s5402_s10 + $0x308] sm:$0xff]  ;;  %v466_v50 = vld [vmem:[%s5402_s10 + $0x310] sm:$0xff] }
  0x2a   : > { %463 = vst [vmem:[%s5407_s11 + $0x180] sm:$0xff] %v462_v48  ;;  %465 = vst [vmem:[%s5407_s11 + $0x188] sm:$0xff] %v464_v49  ;;  %v468_v51 = vld [vmem:[%s5402_s10 + $0x318] sm:$0xff]  ;;  %v470_v52 = vld [vmem:[%s5402_s10 + $0x340] sm:$0xff] }
  0x2b   : > { %467 = vst [vmem:[%s5407_s11 + $0x190] sm:$0xff] %v466_v50  ;;  %v472_v53 = vld [vmem:[%s5402_s10 + $0x348] sm:$0xff]  ;;  %469 = vst [vmem:[%s5407_s11 + $0x198] sm:$0xff] %v468_v51  ;;  %v474_v54 = vld [vmem:[%s5402_s10 + $0x350] sm:$0xff] }
  0x2c   : > { %471 = vst [vmem:[%s5407_s11 + $0x1a0] sm:$0xff] %v470_v52  ;;  %473 = vst [vmem:[%s5407_s11 + $0x1a8] sm:$0xff] %v472_v53  ;;  %v476_v55 = vld [vmem:[%s5402_s10 + $0x358] sm:$0xff]  ;;  %v478_v56 = vld [vmem:[%s5402_s10 + $0x380] sm:$0xff] }
  0x2d   : > { %475 = vst [vmem:[%s5407_s11 + $0x1b0] sm:$0xff] %v474_v54  ;;  %477 = vst [vmem:[%s5407_s11 + $0x1b8] sm:$0xff] %v476_v55  ;;  %v480_v57 = vld [vmem:[%s5402_s10 + $0x388] sm:$0xff]  ;;  %v482_v58 = vld [vmem:[%s5402_s10 + $0x390] sm:$0xff] }
  0x2e   : > { %479 = vst [vmem:[%s5407_s11 + $0x1c0] sm:$0xff] %v478_v56  ;;  %v484_v59 = vld [vmem:[%s5402_s10 + $0x398] sm:$0xff]  ;;  %481 = vst [vmem:[%s5407_s11 + $0x1c8] sm:$0xff] %v480_v57  ;;  %v486_v60 = vld [vmem:[%s5402_s10 + $0x3c0] sm:$0xff] }
  0x2f   : > { %483 = vst [vmem:[%s5407_s11 + $0x1d0] sm:$0xff] %v482_v58  ;;  %485 = vst [vmem:[%s5407_s11 + $0x1d8] sm:$0xff] %v484_v59  ;;  %v488_v61 = vld [vmem:[%s5402_s10 + $0x3c8] sm:$0xff]  ;;  %v490_v62 = vld [vmem:[%s5402_s10 + $0x3d0] sm:$0xff] }
  0x30   : > { %487 = vst [vmem:[%s5407_s11 + $0x1e0] sm:$0xff] %v486_v60  ;;  %489 = vst [vmem:[%s5407_s11 + $0x1e8] sm:$0xff] %v488_v61  ;;  %v492_v63 = vld [vmem:[%s5402_s10 + $0x3d8] sm:$0xff] }
  0x31   : > { %491 = vst [vmem:[%s5407_s11 + $0x1f0] sm:$0xff] %v490_v62  ;;  %493 = vst [vmem:[%s5407_s11 + $0x1f8] sm:$0xff] %v492_v63 }
  0x32 PF: > { %p4078_p5 = scmp.ge.s32.totalorder %s5330_s23, 1  ;;  %p498_p6 = scmp.lt.s32.totalorder %s5330_s23, 3 }
  0x34   : > { %p499_p7 = pnand %p4078_p5, %p498_p6 }
  0x35   : > { %v5539_v0 = vld [vmem:[%s5984_s1] sm:$0x3f] (!%p499_p7)  ;;  %vm570_vm0 = vcmask (!%p499_p7), 1045504   ;;  %s505_s14 = sand.u32 (!%p499_p7), 1, %s5322_s21   ;;  %vm557_vm1 = vcmask (!%p499_p7), 48128   ;;  %v543_v42 = vld [vmem:[%s5985_s2 + $0x8] sm:$0xff] (!%p499_p7) }
  0x36   : > { %502 = sbr.rel (%p499_p7) target bundleno = 4286 (0x10be), region = 78  ;;  %4507 = vmatprep.subr.msk.mxu0 (!%p499_p7), %vm570_vm0, %v5539_v0  ;;  %s4079_s15 = sshll.u32 (!%p499_p7), %s505_s14, 9  ;;  %5009 = vmatprep.subr.msk.mxu1 (!%p499_p7), %vm570_vm0, %v5539_v0  ;;  %v542_v41 = vld [vmem:[%s5985_s2] sm:$0xff] (!%p499_p7)  ;;  %v544_v52 = vld [vmem:[%s5985_s2 + $0x10] sm:$0xff] (!%p499_p7)  ;;  %v545_v53 = vld [vmem:[%s5985_s2 + $0x18] sm:$0xff] (!%p499_p7)  ;;  %vm2189_vm2 = vcmask (!%p499_p7), 261120  }
  0x37   : > { %4508 = vmatpush3.msk.msra.mxu0 (!%p499_p7), %vm570_vm0, %v5539_v0  ;;  %5010 = vmatpush3.msk.msra.mxu1 (!%p499_p7), %vm570_vm0, %v5539_v0  ;;  %s5550_s16 = scalar_lea.vmem (!%p499_p7), [#allocation2], %s4079_s15  ;;  %v5690_v47 = vpack.c.bf16 (!%p499_p7), %v543_v42, %v542_v41  ;;  %v5721_v58 = vpack.c.bf16 (!%p499_p7), %v545_v53, %v544_v52  ;;  %s4080_s18 = sshll.u32 (!%p499_p7), %s4071_s24, 2 }
  0x38   : > { %v547_v1 = vld [vmem:[%s5550_s16] sm:$0xff] (!%p499_p7)  ;;  %4523 = vmatprep.subr.msk.mxu0 (!%p499_p7), %vm570_vm0, %v5539_v0  ;;  %v548_v2 = vld [vmem:[%s5550_s16 + $0x8] sm:$0xff] (!%p499_p7)  ;;  %4515 = vmatprep.subr.msk.mxu1 (!%p499_p7), %vm570_vm0, %v5539_v0  ;;  %v4099_v5 = vld [vmem:[%s5550_s16 + $0x50] sm:$0xff] (!%p499_p7)  ;;  %p536_p8 = scmp.lt.s32.totalorder (!%p499_p7), %s4080_s18, 7 }
  0x39   : > { %v4097_v3 = vld [vmem:[%s5550_s16 + $0x40] sm:$0xff] (!%p499_p7)  ;;  %4509 = vmatprep.mubr.msk.f32.mxu0 (!%p499_p7), %vm557_vm1, %v547_v1  ;;  %v4098_v4 = vld [vmem:[%s5550_s16 + $0x48] sm:$0xff] (!%p499_p7)  ;;  %v4100_v6 = vld [vmem:[%s5550_s16 + $0x58] sm:$0xff] (!%p499_p7)  ;;  %v5332_v1 = vmov (!%p499_p7), 0.0  }
  0x3a   : > { %4510 = vmatmul.mubr.msk.f32.vlgmr.msra.gmra.mrb[0].mxu0 (!%p499_p7), %vm557_vm1, %v548_v2  ;;  %v4115_v7 = vld [vmem:[%s5550_s16 + $0x80] sm:$0xff] (!%p499_p7)  ;;  %v549_v8 = vld [vmem:[%s5550_s16 + $0x10] sm:$0xff] (!%p499_p7)  ;;  %v550_v9 = vld [vmem:[%s5550_s16 + $0x18] sm:$0xff] (!%p499_p7) }
  0x3b   : > { %4524 = vmatpush3.msk.msra.mxu0 (!%p499_p7), %vm570_vm0, %v5539_v0  ;;  %4525 = vmatprep.mubr.msk.f32.mxu0 (!%p499_p7), %vm557_vm1, %v4097_v3  ;;  %v4088_v10 = vld [vmem:[%s5550_s16 + $0x20] sm:$0xff] (!%p499_p7)  ;;  %v4116_v11 = vld [vmem:[%s5550_s16 + $0x88] sm:$0xff] (!%p499_p7)  ;;  %v4117_v12 = vld [vmem:[%s5550_s16 + $0x90] sm:$0xff] (!%p499_p7) }
  0x3c   : > { %4539 = vmatprep.subr.msk.mxu0 (!%p499_p7), %vm570_vm0, %v5539_v0  ;;  %4512 = vmatprep.mubr.msk.f32.mxu1 (!%p499_p7), %vm557_vm1, %v549_v8  ;;  %v4089_v13 = vld [vmem:[%s5550_s16 + $0x28] sm:$0xff] (!%p499_p7)  ;;  %v4090_v14 = vld [vmem:[%s5550_s16 + $0x30] sm:$0xff] (!%p499_p7)  ;;  %v4118_v15 = vld [vmem:[%s5550_s16 + $0x98] sm:$0xff] (!%p499_p7) }
  0x3d   : > { %4513 = vmatmul.mubr.msk.f32.vlgmr.msra.gmra.mrb[0].mxu1 %vm557_vm1, %v550_v9  ;;  %v4133_v16 = vld [vmem:[%s5550_s16 + $0xc0] sm:$0xff]  ;;  %v4091_v17 = vld [vmem:[%s5550_s16 + $0x38] sm:$0xff]  ;;  %v4134_v19 = vld [vmem:[%s5550_s16 + $0xc8] sm:$0xff]  ;;  %s5994_s18 = smov (!%p536_p8, %s4080_s18), 7 }
  0x3e   : > { %4526 = vmatmul.mubr.msk.f32.vlgmr.msra.gmra.mrb[2].mxu0 %vm557_vm1, %v4098_v4  ;;  %4516 = vmatpush3.msk.msra.mxu1 %vm570_vm0, %v5539_v0  ;;  %v4106_v18 = vld [vmem:[%s5550_s16 + $0x60] sm:$0xff]  ;;  %v4135_v20 = vld [vmem:[%s5550_s16 + $0xd0] sm:$0xff]  ;;  %v4107_v21 = vld [vmem:[%s5550_s16 + $0x68] sm:$0xff]  ;;  %s4081_s19 = sshll.u32 %s5994_s18, 3 }
  0x3f   : > { %4540 = vmatpush3.msk.msra.mxu0 %vm570_vm0, %v5539_v0  ;;  %4528 = vmatprep.mubr.msk.f32.mxu0 %vm557_vm1, %v4099_v5  ;;  %v4108_v22 = vld [vmem:[%s5550_s16 + $0x70] sm:$0xff]  ;;  %v4136_v23 = vld [vmem:[%s5550_s16 + $0xd8] sm:$0xff]  ;;  %v4151_v24 = vld [vmem:[%s5550_s16 + $0x100] sm:$0xff]  ;;  %s539_s26 = scalar_lea.vmem %s5989_s6, %s4081_s19 }
  0x40   : > { %4555 = vmatprep.subr.msk.mxu0 %vm570_vm0, %v5539_v0  ;;  %4517 = vmatprep.mubr.msk.f32.mxu1 %vm557_vm1, %v4088_v10  ;;  %v4109_v25 = vld [vmem:[%s5550_s16 + $0x78] sm:$0xff]  ;;  %v4124_v26 = vld [vmem:[%s5550_s16 + $0xa0] sm:$0xff]  ;;  %v4152_v27 = vld [vmem:[%s5550_s16 + $0x108] sm:$0xff] }
  0x41   : > { %4531 = vmatprep.subr.msk.mxu1 %vm570_vm0, %v5539_v0  ;;  %4518 = vmatmul.mubr.msk.f32.vlgmr.msra.gmra.mrb[2].mxu1 %vm557_vm1, %v4089_v13  ;;  %v4153_v28 = vld [vmem:[%s5550_s16 + $0x110] sm:$0xff]  ;;  %v4125_v29 = vld [vmem:[%s5550_s16 + $0xa8] sm:$0xff]  ;;  %v4154_v31 = vld [vmem:[%s5550_s16 + $0x118] sm:$0xff] }
  0x42   : > { %4529 = vmatmul.mubr.msk.f32.gmra.mrb[4].mxu0 %vm557_vm1, %v4100_v6  ;;  %4532 = vmatpush3.msk.msra.mxu1 %vm570_vm0, %v5539_v0  ;;  %v4126_v30 = vld [vmem:[%s5550_s16 + $0xb0] sm:$0xff]  ;;  %v4169_v32 = vld [vmem:[%s5550_s16 + $0x140] sm:$0xff]  ;;  %v4127_v33 = vld [vmem:[%s5550_s16 + $0xb8] sm:$0xff] }
  0x43   : > { %4541 = vmatprep.mubr.msk.f32.mxu0 %vm557_vm1, %v4115_v7  ;;  %4520 = vmatprep.mubr.msk.f32.mxu1 %vm557_vm1, %v4090_v14  ;;  %v4142_v34 = vld [vmem:[%s5550_s16 + $0xe0] sm:$0xff]  ;;  %v4170_v35 = vld [vmem:[%s5550_s16 + $0x148] sm:$0xff]  ;;  %v4171_v36 = vld [vmem:[%s5550_s16 + $0x150] sm:$0xff] }
  0x44   : > { %4547 = vmatprep.subr.msk.mxu1 %vm570_vm0, %v5539_v0  ;;  %v4143_v37 = vld [vmem:[%s5550_s16 + $0xe8] sm:$0xff]  ;;  %v4144_v38 = vld [vmem:[%s5550_s16 + $0xf0] sm:$0xff]  ;;  %v4172_v39 = vld [vmem:[%s5550_s16 + $0x158] sm:$0xff] }
  0x45   : > { %4521 = vmatmul.mubr.msk.f32.gmra.mrb[4].mxu1 %vm557_vm1, %v4091_v17  ;;  %v4187_v40 = vld [vmem:[%s5550_s16 + $0x180] sm:$0xff]  ;;  %v4145_v43 = vld [vmem:[%s5550_s16 + $0xf8] sm:$0xff]  ;;  %v4188_v45 = vld [vmem:[%s5550_s16 + $0x188] sm:$0xff] }
  0x46   : > { %4542 = vmatmul.mubr.msk.f32.vlgmr.msra.gmra.mrb[6].mxu0 %vm557_vm1, %v4116_v11  ;;  %4533 = vmatprep.mubr.msk.f32.mxu1 %vm557_vm1, %v4106_v18  ;;  %v4160_v44 = vld [vmem:[%s5550_s16 + $0x120] sm:$0xff]  ;;  %v4189_v46 = vld [vmem:[%s5550_s16 + $0x190] sm:$0xff]  ;;  %v4161_v48 = vld [vmem:[%s5550_s16 + $0x128] sm:$0xff] }
  0x47   : > { %4556 = vmatpush3.msk.msra.mxu0 %vm570_vm0, %v5539_v0  ;;  %4544 = vmatprep.mubr.msk.f32.mxu0 %vm557_vm1, %v4117_v12  ;;  %v4162_v49 = vld [vmem:[%s5550_s16 + $0x130] sm:$0xff]  ;;  %v4190_v50 = vld [vmem:[%s5550_s16 + $0x198] sm:$0xff]  ;;  %v4205_v51 = vld [vmem:[%s5550_s16 + $0x1c0] sm:$0xff] }
  0x48   : > { %4571 = vmatprep.subr.msk.mxu0 %vm570_vm0, %v5539_v0  ;;  %v4163_v54 = vld [vmem:[%s5550_s16 + $0x138] sm:$0xff]  ;;  %v4178_v55 = vld [vmem:[%s5550_s16 + $0x160] sm:$0xff]  ;;  %v4206_v56 = vld [vmem:[%s5550_s16 + $0x1c8] sm:$0xff] }
  0x49   : > { %4534 = vmatmul.mubr.msk.f32.vlgmr.msra.gmra.mrb[6].mxu1 %vm557_vm1, %v4107_v21  ;;  %v4207_v57 = vld [vmem:[%s5550_s16 + $0x1d0] sm:$0xff]  ;;  %v4179_v59 = vld [vmem:[%s5550_s16 + $0x168] sm:$0xff]  ;;  %v4208_v61 = vld [vmem:[%s5550_s16 + $0x1d8] sm:$0xff] }
  0x4a   : > { %4545 = vmatmul.mubr.msk.f32.gmra.mrb[8].mxu0 %vm557_vm1, %v4118_v15  ;;  %4548 = vmatpush3.msk.msra.mxu1 %vm570_vm0, %v5539_v0  ;;  %v4180_v60 = vld [vmem:[%s5550_s16 + $0x170] sm:$0xff]  ;;  %v4181_v62 = vld [vmem:[%s5550_s16 + $0x178] sm:$0xff]  ;;  %v4196_v63 = vld [vmem:[%s5550_s16 + $0x1a0] sm:$0xff] }
  0x4b   : > { %4557 = vmatprep.mubr.msk.f32.mxu0 %vm557_vm1, %v4133_v16  ;;  %4536 = vmatprep.mubr.msk.f32.mxu1 %vm557_vm1, %v4108_v22  ;;  %v4197_v2 = vld [vmem:[%s5550_s16 + $0x1a8] sm:$0xff]  ;;  %v4198_v3 = vld [vmem:[%s5550_s16 + $0x1b0] sm:$0xff]  ;;  %v4199_v4 = vld [vmem:[%s5550_s16 + $0x1b8] sm:$0xff] }
  0x4c   : > { %4563 = vmatprep.subr.msk.mxu1 %vm570_vm0, %v5539_v0  ;;  %v4214_v5 = vld [vmem:[%s5550_s16 + $0x1e0] sm:$0xff]  ;;  %v4215_v6 = vld [vmem:[%s5550_s16 + $0x1e8] sm:$0xff]  ;;  %v4217_v7 = vld [vmem:[%s5550_s16 + $0x1f8] sm:$0xff] }
  0x4d   : > { %4537 = vmatmul.mubr.msk.f32.gmra.mrb[8].mxu1 %vm557_vm1, %v4109_v25  ;;  %v5773_v10 = vld [vmem:[%s5986_s3] ss:$0 sm:$0xff] }
  0x4e   : > { %4558 = vmatmul.mubr.msk.f32.vlgmr.msra.gmra.mrb[10].mxu0 %vm557_vm1, %v4134_v19  ;;  %4549 = vmatprep.mubr.msk.f32.mxu1 %vm557_vm1, %v4124_v26 }
  0x4f   : > { %4572 = vmatpush3.msk.msra.mxu0 %vm570_vm0, %v5539_v0  ;;  %4560 = vmatprep.mubr.msk.f32.mxu0 %vm557_vm1, %v4135_v20 }
  0x50   : > { %4587 = vmatprep.subr.msk.mxu0 %vm570_vm0, %v5539_v0 }
  0x51   : > { %4550 = vmatmul.mubr.msk.f32.vlgmr.msra.gmra.mrb[10].mxu1 %vm557_vm1, %v4125_v29 }
  0x52   : > { %4561 = vmatmul.mubr.msk.f32.gmra.mrb[12].mxu0 %vm557_vm1, %v4136_v23  ;;  %4564 = vmatpush3.msk.msra.mxu1 %vm570_vm0, %v5539_v0 }
  0x53   : > { %4573 = vmatprep.mubr.msk.f32.mxu0 %vm557_vm1, %v4151_v24  ;;  %4552 = vmatprep.mubr.msk.f32.mxu1 %vm557_vm1, %v4126_v30 }
  0x54   : > { %4579 = vmatprep.subr.msk.mxu1 %vm570_vm0, %v5539_v0 }
  0x55   : > { %4553 = vmatmul.mubr.msk.f32.gmra.mrb[12].mxu1 %vm557_vm1, %v4127_v33 }
  0x56   : > { %4574 = vmatmul.mubr.msk.f32.vlgmr.msra.gmra.mrb[14].mxu0 %vm557_vm1, %v4152_v27  ;;  %4565 = vmatprep.mubr.msk.f32.mxu1 %vm557_vm1, %v4142_v34 }
  0x57   : > { %4588 = vmatpush3.msk.msra.mxu0 %vm570_vm0, %v5539_v0  ;;  %4576 = vmatprep.mubr.msk.f32.mxu0 %vm557_vm1, %v4153_v28 }
  0x58   : > { %4603 = vmatprep.subr.msk.mxu0 %vm570_vm0, %v5539_v0 }
  0x59   : > { %4566 = vmatmul.mubr.msk.f32.vlgmr.msra.gmra.mrb[14].mxu1 %vm557_vm1, %v4143_v37 }
  0x5a   : > { %4577 = vmatmul.mubr.msk.f32.gmra.mrb[16].mxu0 %vm557_vm1, %v4154_v31  ;;  %4580 = vmatpush3.msk.msra.mxu1 %vm570_vm0, %v5539_v0 }
  0x5b   : > { %4589 = vmatprep.mubr.msk.f32.mxu0 %vm557_vm1, %v4169_v32  ;;  %4568 = vmatprep.mubr.msk.f32.mxu1 %vm557_vm1, %v4144_v38 }
  0x5c   : > { %4595 = vmatprep.subr.msk.mxu1 %vm570_vm0, %v5539_v0 }
  0x5d   : > { %4569 = vmatmul.mubr.msk.f32.gmra.mrb[16].mxu1 %vm557_vm1, %v4145_v43 }
  0x5e   : > { %4590 = vmatmul.mubr.msk.f32.vlgmr.msra.gmra.mrb[18].mxu0 %vm557_vm1, %v4170_v35  ;;  %4581 = vmatprep.mubr.msk.f32.mxu1 %vm557_vm1, %v4160_v44 }
  0x5f   : > { %4604 = vmatpush3.msk.msra.mxu0 %vm570_vm0, %v5539_v0  ;;  %4592 = vmatprep.mubr.msk.f32.mxu0 %vm557_vm1, %v4171_v36 }
  0x60   : > { %4619 = vmatprep.subr.msk.mxu0 %vm570_vm0, %v5539_v0 }
  0x61   : > { %4582 = vmatmul.mubr.msk.f32.vlgmr.msra.gmra.mrb[18].mxu1 %vm557_vm1, %v4161_v48 }
  0x62   : > { %4593 = vmatmul.mubr.msk.f32.gmra.mrb[20].mxu0 %vm557_vm1, %v4172_v39  ;;  %4596 = vmatpush3.msk.msra.mxu1 %vm570_vm0, %v5539_v0 }
  0x63   : > { %4605 = vmatprep.mubr.msk.f32.mxu0 %vm557_vm1, %v4187_v40  ;;  %4584 = vmatprep.mubr.msk.f32.mxu1 %vm557_vm1, %v4162_v49 }
  0x64   : > { %4611 = vmatprep.subr.msk.mxu1 %vm570_vm0, %v5539_v0 }
  0x65   : > { %4585 = vmatmul.mubr.msk.f32.gmra.mrb[20].mxu1 %vm557_vm1, %v4163_v54 }
  0x66   : > { %4606 = vmatmul.mubr.msk.f32.vlgmr.msra.gmra.mrb[22].mxu0 %vm557_vm1, %v4188_v45  ;;  %4597 = vmatprep.mubr.msk.f32.mxu1 %vm557_vm1, %v4178_v55 }
  0x67   : > { %4620 = vmatpush3.msk.msra.mxu0 %vm570_vm0, %v5539_v0  ;;  %4608 = vmatprep.mubr.msk.f32.mxu0 %vm557_vm1, %v4189_v46 }
  0x68   : > { %4874 = vmatprep.subr.bf16.mxu0 %v5690_v47 }
  0x69   : > { %4598 = vmatmul.mubr.msk.f32.vlgmr.msra.gmra.mrb[22].mxu1 %vm557_vm1, %v4179_v59 }
  0x6a   : > { %4609 = vmatmul.mubr.msk.f32.gmra.mrb[24].mxu0 %vm557_vm1, %v4190_v50  ;;  %4612 = vmatpush3.msk.msra.mxu1 %vm570_vm0, %v5539_v0 }
  0x6b   : > { %4621 = vmatprep.mubr.msk.f32.mxu0 %vm557_vm1, %v4205_v51  ;;  %4600 = vmatprep.mubr.msk.f32.mxu1 %vm557_vm1, %v4180_v60 }
  0x6c   : > { %4627 = vmatprep.subr.msk.mxu1 %vm570_vm0, %v5539_v0 }
  0x6d   : > { %4601 = vmatmul.mubr.msk.f32.gmra.mrb[24].mxu1 %vm557_vm1, %v4181_v62 }
  0x6e   : > { %4622 = vmatmul.mubr.msk.f32.vlgmr.msra.gmra.mrb[26].mxu0 %vm557_vm1, %v4206_v56  ;;  %4613 = vmatprep.mubr.msk.f32.mxu1 %vm557_vm1, %v4196_v63 }
  0x6f   : > { %4876 = vmatpush3.bf16.msra.mxu0 %v5690_v47  ;;  %4624 = vmatprep.mubr.msk.f32.mxu0 %vm557_vm1, %v4207_v57 }
  0x70   : > { %4878 = vmatprep.subr.bf16.mxu0 %v5721_v58 }
  0x71   : > { %4614 = vmatmul.mubr.msk.f32.vlgmr.msra.gmra.mrb[26].mxu1 %vm557_vm1, %v4197_v2 }
  0x72   : > { %4625 = vmatmul.mubr.msk.f32.gmra.mrb[28].mxu0 %vm557_vm1, %v4208_v61  ;;  %4628 = vmatpush3.msk.msra.mxu1 %vm570_vm0, %v5539_v0  ;;  %v4216_v0 = vld [vmem:[%s5550_s16 + $0x1f0] sm:$0xff] }
  0x73   : > { %4880 = vmatpush3.bf16.msra.mxu0 %v5721_v58  ;;  %4643 = vmatprep.mubr.f32.mxu0 %v5332_v1 }
  0x74   : > { %4890 = vmatprep.subr.bf16.mxu0 %v5690_v47  ;;  %4882 = vmatprep.subr.bf16.mxu1 %v5690_v47 }
  0x75   : > { %4616 = vmatprep.mubr.msk.f32.mxu1 %vm557_vm1, %v4198_v3 }
  0x76   : > { %4644 = vmatmul.mubr.f32.vlgmr.msra.gmra.mrb[0].mxu0 %v5332_v1  ;;  %4617 = vmatmul.mubr.msk.f32.gmra.mrb[28].mxu1 %vm557_vm1, %v4199_v4 }
  0x77   : > { %4646 = vmatprep.mubr.f32.mxu0 %v5332_v1  ;;  %4892 = vmatpush3.bf16.msra.mxu0 %v5690_v47 }
  0x78   : > { %4894 = vmatprep.subr.bf16.mxu0 %v5721_v58  ;;  %4629 = vmatprep.mubr.msk.f32.mxu1 %vm557_vm1, %v4214_v5 }
  0x7a   : > { %4647 = vmatmul.mubr.f32.gmra.mrb[30].mxu0 %v5332_v1  ;;  %4630 = vmatmul.mubr.msk.f32.vlgmr.msra.gmra.mrb[30].mxu1 %vm557_vm1, %v4215_v6 }
  0x7b   : > { %4896 = vmatpush3.bf16.msra.mxu0 %v5721_v58  ;;  %4884 = vmatpush3.bf16.msra.mxu1 %v5690_v47 }
  0x7c   : > { %4906 = vmatprep.subr.bf16.mxu0 %v5690_v47  ;;  %4632 = vmatprep.mubr.msk.f32.mxu1 %vm557_vm1, %v4216_v0 }
  0x7d   : > { %4886 = vmatprep.subr.bf16.mxu1 %v5721_v58 }
  0x7e   : > { %4633 = vmatmul.mubr.msk.f32.gmra.mrb[32].mxu1 %vm557_vm1, %v4217_v7 }
  0x7f   : > { %4888 = vmatpush3.bf16.msra.mxu1 %v5721_v58 }
  0x80   : > { %4898 = vmatprep.subr.bf16.mxu1 %v5690_v47 }
 0x110   : > { %v4514_v8 = vpop.f32.mrb[0].mxu1 }
 0x111   : > { %v650_v9 = vpop.f32.mrb[1].mxu1  ;;  %v656_v13 = vadd.f32 %v4514_v8, %v5773_v10 }
 0x112   : > { %v651_v16 = vadd.f32 %v5773_v10, %v650_v9 }
 0x149   : > { %v4645_v11 = vpop.f32.mrb[0].mxu0 }
 0x14a   : > { %v5011_v12 = vadd.f32 %v4645_v11, %v5773_v10  ;;  %v2259_v14 = vpop.f32.mrb[1].mxu0 }
 0x14b   : > { %v5012_v15 = vadd.f32 %v5773_v10, %v2259_v14 }
 0x14d   : > { %5164 = vtanh.f32 %v5012_v15  ;;  %v4648_v17 = vpop.f32.mrb[30].mxu0 }
 0x14e   : > { %5166 = vtanh.f32 %v5011_v12  ;;  %v2281_v18 = vadd.f32 %v4648_v17, %v656_v13  ;;  %v2269_v19 = vpop.f32.mrb[31].mxu0 }
 0x14f   : > { %v2280_v20 = vadd.f32 %v2269_v19, %v651_v16 }
 0x151   : > { %5168 = vtanh.f32 %v2280_v20 }
 0x152   : > { %5170 = vtanh.f32 %v2281_v18 }
 0x157   : > { %v5165_v21 = vpop.eup %5164 }
 0x158   : > { %v5167_v22 = vpop.eup %5166  ;;  %4657 = vmatprep.mubr.msk.f32.mxu1 %vm2189_vm2, %v5165_v21 }
 0x159   : > { %4658 = vmatmul.mubr.msk.f32.vlgmr.msra.gmra.mrb[2].mxu1 %vm2189_vm2, %v5167_v22 }
 0x15a   : > { %4900 = vmatpush3.bf16.msra.mxu1 %v5690_v47 }
 0x15b   : > { %v5169_v23 = vpop.eup %5168  ;;  %4902 = vmatprep.subr.bf16.mxu1 %v5721_v58 }
 0x15c   : > { %v5171_v24 = vpop.eup %5170  ;;  %4660 = vmatprep.mubr.msk.f32.mxu1 %vm2189_vm2, %v5169_v23 }
 0x15d   : > { %4661 = vmatmul.mubr.msk.f32.gmra.mrb[4].mxu1 %vm2189_vm2, %v5171_v24 }
 0x15e   : > { %4904 = vmatpush3.bf16.msra.mxu1 %v5721_v58 }
 0x15f   : > { %4914 = vmatprep.subr.bf16.mxu1 %v5690_v47 }
 0x22c   : > { %v4659_v25 = vpop.f32.mrb[2].mxu1 }
 0x22d   : > { %v5017_v26 = vadd.f32 %v4659_v25, %v5773_v10  ;;  %v2364_v27 = vpop.f32.mrb[3].mxu1 }
 0x22e   : > { %v5018_v28 = vadd.f32 %v5773_v10, %v2364_v27 }
 0x230   : > { %5172 = vtanh.f32 %v5018_v28  ;;  %v4662_v29 = vpop.f32.mrb[4].mxu1 }
 0x231   : > { %5174 = vtanh.f32 %v5017_v26  ;;  %v5019_v30 = vadd.f32 %v4662_v29, %v5773_v10  ;;  %v2374_v31 = vpop.f32.mrb[5].mxu1 }
 0x232   : > { %v5020_v32 = vadd.f32 %v5773_v10, %v2374_v31 }
 0x234   : > { %5176 = vtanh.f32 %v5020_v32 }
 0x235   : > { %5178 = vtanh.f32 %v5019_v30 }
 0x23a   : > { %v5173_v33 = vpop.eup %5172 }
 0x23b   : > { %v5175_v34 = vpop.eup %5174  ;;  %4671 = vmatprep.mubr.msk.f32.mxu0 %vm2189_vm2, %v5173_v33 }
 0x23c   : > { %4672 = vmatmul.mubr.msk.f32.vlgmr.msra.gmra.mrb[2].mxu0 %vm2189_vm2, %v5175_v34 }
 0x23d   : > { %4908 = vmatpush3.bf16.msra.mxu0 %v5690_v47 }
 0x23e   : > { %v5177_v35 = vpop.eup %5176  ;;  %4910 = vmatprep.subr.bf16.mxu0 %v5721_v58 }
 0x23f   : > { %v5179_v36 = vpop.eup %5178  ;;  %4674 = vmatprep.mubr.msk.f32.mxu0 %vm2189_vm2, %v5177_v35 }
 0x240   : > { %4675 = vmatmul.mubr.msk.f32.gmra.mrb[4].mxu0 %vm2189_vm2, %v5179_v36 }
 0x241   : > { %4912 = vmatpush3.bf16.msra.mxu0 %v5721_v58 }
 0x242   : > { %4922 = vmatprep.subr.bf16.mxu0 %v5690_v47 }
 0x30f   : > { %v4673_v37 = vpop.f32.mrb[2].mxu0 }
 0x310   : > { %v5021_v38 = vadd.f32 %v4673_v37, %v5773_v10  ;;  %v2469_v39 = vpop.f32.mrb[3].mxu0 }
 0x311   : > { %v5022_v40 = vadd.f32 %v5773_v10, %v2469_v39 }
 0x313   : > { %5180 = vtanh.f32 %v5022_v40  ;;  %v4676_v41 = vpop.f32.mrb[4].mxu0 }
 0x314   : > { %5182 = vtanh.f32 %v5021_v38  ;;  %v5023_v42 = vadd.f32 %v4676_v41, %v5773_v10  ;;  %v2479_v43 = vpop.f32.mrb[5].mxu0 }
 0x315   : > { %v5024_v44 = vadd.f32 %v5773_v10, %v2479_v43 }
 0x317   : > { %5184 = vtanh.f32 %v5024_v44 }
 0x318   : > { %5186 = vtanh.f32 %v5023_v42 }
 0x31d   : > { %v5181_v45 = vpop.eup %5180 }
 0x31e   : > { %v5183_v46 = vpop.eup %5182  ;;  %4685 = vmatprep.mubr.msk.f32.mxu1 %vm2189_vm2, %v5181_v45 }
 0x31f   : > { %4686 = vmatmul.mubr.msk.f32.vlgmr.msra.gmra.mrb[6].mxu1 %vm2189_vm2, %v5183_v46 }
 0x320   : > { %4916 = vmatpush3.bf16.msra.mxu1 %v5690_v47 }
 0x321   : > { %v5185_v48 = vpop.eup %5184  ;;  %4918 = vmatprep.subr.bf16.mxu1 %v5721_v58 }
 0x322   : > { %v5187_v49 = vpop.eup %5186  ;;  %4688 = vmatprep.mubr.msk.f32.mxu1 %vm2189_vm2, %v5185_v48 }
 0x323   : > { %4689 = vmatmul.mubr.msk.f32.gmra.mrb[8].mxu1 %vm2189_vm2, %v5187_v49 }
 0x324   : > { %4920 = vmatpush3.bf16.msra.mxu1 %v5721_v58 }
 0x325   : > { %4930 = vmatprep.subr.bf16.mxu1 %v5690_v47 }
 0x3f2   : > { %v4687_v50 = vpop.f32.mrb[6].mxu1 }
 0x3f3   : > { %v5025_v51 = vadd.f32 %v4687_v50, %v5773_v10  ;;  %v2574_v52 = vpop.f32.mrb[7].mxu1 }
 0x3f4   : > { %v5026_v53 = vadd.f32 %v5773_v10, %v2574_v52 }
 0x3f6   : > { %5188 = vtanh.f32 %v5026_v53  ;;  %v4690_v54 = vpop.f32.mrb[8].mxu1 }
 0x3f7   : > { %5190 = vtanh.f32 %v5025_v51  ;;  %v5027_v55 = vadd.f32 %v4690_v54, %v5773_v10  ;;  %v2584_v56 = vpop.f32.mrb[9].mxu1 }
 0x3f8   : > { %v5028_v57 = vadd.f32 %v5773_v10, %v2584_v56 }
 0x3fa   : > { %5192 = vtanh.f32 %v5028_v57 }
 0x3fb   : > { %5194 = vtanh.f32 %v5027_v55 }
 0x400   : > { %v5189_v59 = vpop.eup %5188 }
 0x401   : > { %v5191_v60 = vpop.eup %5190  ;;  %4699 = vmatprep.mubr.msk.f32.mxu0 %vm2189_vm2, %v5189_v59 }
 0x402   : > { %4700 = vmatmul.mubr.msk.f32.vlgmr.msra.gmra.mrb[6].mxu0 %vm2189_vm2, %v5191_v60 }
 0x403   : > { %4924 = vmatpush3.bf16.msra.mxu0 %v5690_v47 }
 0x404   : > { %v5193_v61 = vpop.eup %5192  ;;  %4926 = vmatprep.subr.bf16.mxu0 %v5721_v58 }
 0x405   : > { %v5195_v62 = vpop.eup %5194  ;;  %4702 = vmatprep.mubr.msk.f32.mxu0 %vm2189_vm2, %v5193_v61 }
 0x406   : > { %4703 = vmatmul.mubr.msk.f32.gmra.mrb[8].mxu0 %vm2189_vm2, %v5195_v62 }
 0x407   : > { %4928 = vmatpush3.bf16.msra.mxu0 %v5721_v58 }
 0x408   : > { %4938 = vmatprep.subr.bf16.mxu0 %v5690_v47 }
 0x4d5   : > { %v4701_v63 = vpop.f32.mrb[6].mxu0 }
 0x4d6   : > { %v5029_v1 = vadd.f32 %v4701_v63, %v5773_v10  ;;  %v2679_v2 = vpop.f32.mrb[7].mxu0 }
 0x4d7   : > { %v5030_v3 = vadd.f32 %v5773_v10, %v2679_v2 }
 0x4d9   : > { %5196 = vtanh.f32 %v5030_v3  ;;  %v4704_v4 = vpop.f32.mrb[8].mxu0 }
 0x4da   : > { %5198 = vtanh.f32 %v5029_v1  ;;  %v5031_v5 = vadd.f32 %v4704_v4, %v5773_v10  ;;  %v2689_v6 = vpop.f32.mrb[9].mxu0 }
 0x4db   : > { %v5032_v0 = vadd.f32 %v5773_v10, %v2689_v6 }
 0x4dd   : > { %5200 = vtanh.f32 %v5032_v0 }
 0x4de   : > { %5202 = vtanh.f32 %v5031_v5 }
 0x4e3   : > { %v5197_v7 = vpop.eup %5196 }
 0x4e4   : > { %v5199_v8 = vpop.eup %5198  ;;  %4713 = vmatprep.mubr.msk.f32.mxu1 %vm2189_vm2, %v5197_v7 }
 0x4e5   : > { %4714 = vmatmul.mubr.msk.f32.vlgmr.msra.gmra.mrb[10].mxu1 %vm2189_vm2, %v5199_v8 }
 0x4e6   : > { %4932 = vmatpush3.bf16.msra.mxu1 %v5690_v47 }
 0x4e7   : > { %v5201_v9 = vpop.eup %5200  ;;  %4934 = vmatprep.subr.bf16.mxu1 %v5721_v58 }
 0x4e8   : > { %v5203_v11 = vpop.eup %5202  ;;  %4716 = vmatprep.mubr.msk.f32.mxu1 %vm2189_vm2, %v5201_v9 }
 0x4e9   : > { %4717 = vmatmul.mubr.msk.f32.gmra.mrb[12].mxu1 %vm2189_vm2, %v5203_v11 }
 0x4ea   : > { %4936 = vmatpush3.bf16.msra.mxu1 %v5721_v58 }
 0x4eb   : > { %4946 = vmatprep.subr.bf16.mxu1 %v5690_v47 }
 0x5b8   : > { %v4715_v12 = vpop.f32.mrb[10].mxu1 }
 0x5b9   : > { %v5033_v13 = vadd.f32 %v4715_v12, %v5773_v10  ;;  %v2784_v14 = vpop.f32.mrb[11].mxu1 }
 0x5ba   : > { %v5034_v15 = vadd.f32 %v5773_v10, %v2784_v14 }
 0x5bc   : > { %5204 = vtanh.f32 %v5034_v15  ;;  %v4718_v16 = vpop.f32.mrb[12].mxu1 }
 0x5bd   : > { %5206 = vtanh.f32 %v5033_v13  ;;  %v5035_v17 = vadd.f32 %v4718_v16, %v5773_v10  ;;  %v2794_v18 = vpop.f32.mrb[13].mxu1 }
 0x5be   : > { %v5036_v19 = vadd.f32 %v5773_v10, %v2794_v18 }
 0x5c0   : > { %5208 = vtanh.f32 %v5036_v19 }
 0x5c1   : > { %5210 = vtanh.f32 %v5035_v17 }
 0x5c6   : > { %v5205_v20 = vpop.eup %5204 }
 0x5c7   : > { %v5207_v21 = vpop.eup %5206  ;;  %4727 = vmatprep.mubr.msk.f32.mxu0 %vm2189_vm2, %v5205_v20 }
 0x5c8   : > { %4728 = vmatmul.mubr.msk.f32.vlgmr.msra.gmra.mrb[10].mxu0 %vm2189_vm2, %v5207_v21 }
 0x5c9   : > { %4940 = vmatpush3.bf16.msra.mxu0 %v5690_v47 }
 0x5ca   : > { %v5209_v22 = vpop.eup %5208  ;;  %4942 = vmatprep.subr.bf16.mxu0 %v5721_v58 }
 0x5cb   : > { %v5211_v23 = vpop.eup %5210  ;;  %4730 = vmatprep.mubr.msk.f32.mxu0 %vm2189_vm2, %v5209_v22 }
 0x5cc   : > { %4731 = vmatmul.mubr.msk.f32.gmra.mrb[12].mxu0 %vm2189_vm2, %v5211_v23 }
 0x5cd   : > { %4944 = vmatpush3.bf16.msra.mxu0 %v5721_v58 }
 0x5ce   : > { %4954 = vmatprep.subr.bf16.mxu0 %v5690_v47 }
 0x69b   : > { %v4729_v24 = vpop.f32.mrb[10].mxu0 }
 0x69c   : > { %v5037_v25 = vadd.f32 %v4729_v24, %v5773_v10  ;;  %v2889_v26 = vpop.f32.mrb[11].mxu0 }
 0x69d   : > { %v5038_v27 = vadd.f32 %v5773_v10, %v2889_v26 }
 0x69f   : > { %5212 = vtanh.f32 %v5038_v27  ;;  %v4732_v28 = vpop.f32.mrb[12].mxu0 }
 0x6a0   : > { %5214 = vtanh.f32 %v5037_v25  ;;  %v5039_v29 = vadd.f32 %v4732_v28, %v5773_v10  ;;  %v2899_v30 = vpop.f32.mrb[13].mxu0 }
 0x6a1   : > { %v5040_v31 = vadd.f32 %v5773_v10, %v2899_v30 }
 0x6a3   : > { %5216 = vtanh.f32 %v5040_v31 }
 0x6a4   : > { %5218 = vtanh.f32 %v5039_v29 }
 0x6a9   : > { %v5213_v32 = vpop.eup %5212 }
 0x6aa   : > { %v5215_v33 = vpop.eup %5214  ;;  %4741 = vmatprep.mubr.msk.f32.mxu1 %vm2189_vm2, %v5213_v32 }
 0x6ab   : > { %4742 = vmatmul.mubr.msk.f32.vlgmr.msra.gmra.mrb[14].mxu1 %vm2189_vm2, %v5215_v33 }
 0x6ac   : > { %4948 = vmatpush3.bf16.msra.mxu1 %v5690_v47 }
 0x6ad   : > { %v5217_v34 = vpop.eup %5216  ;;  %4950 = vmatprep.subr.bf16.mxu1 %v5721_v58 }
 0x6ae   : > { %v5219_v35 = vpop.eup %5218  ;;  %4744 = vmatprep.mubr.msk.f32.mxu1 %vm2189_vm2, %v5217_v34 }
 0x6af   : > { %4745 = vmatmul.mubr.msk.f32.gmra.mrb[16].mxu1 %vm2189_vm2, %v5219_v35 }
 0x6b0   : > { %4952 = vmatpush3.bf16.msra.mxu1 %v5721_v58 }
 0x6b1   : > { %4962 = vmatprep.subr.bf16.mxu1 %v5690_v47 }
 0x77e   : > { %v4743_v36 = vpop.f32.mrb[14].mxu1 }
 0x77f   : > { %v5041_v37 = vadd.f32 %v4743_v36, %v5773_v10  ;;  %v2994_v38 = vpop.f32.mrb[15].mxu1 }
 0x780   : > { %v5042_v39 = vadd.f32 %v5773_v10, %v2994_v38 }
 0x782   : > { %5220 = vtanh.f32 %v5042_v39  ;;  %v4746_v40 = vpop.f32.mrb[16].mxu1 }
 0x783   : > { %5222 = vtanh.f32 %v5041_v37  ;;  %v5043_v41 = vadd.f32 %v4746_v40, %v5773_v10  ;;  %v3004_v42 = vpop.f32.mrb[17].mxu1 }
 0x784   : > { %v5044_v43 = vadd.f32 %v5773_v10, %v3004_v42 }
 0x786   : > { %5224 = vtanh.f32 %v5044_v43 }
 0x787   : > { %5226 = vtanh.f32 %v5043_v41 }
 0x78c   : > { %v5221_v44 = vpop.eup %5220 }
 0x78d   : > { %v5223_v45 = vpop.eup %5222  ;;  %4755 = vmatprep.mubr.msk.f32.mxu0 %vm2189_vm2, %v5221_v44 }
 0x78e   : > { %4756 = vmatmul.mubr.msk.f32.vlgmr.msra.gmra.mrb[14].mxu0 %vm2189_vm2, %v5223_v45 }
 0x78f   : > { %4956 = vmatpush3.bf16.msra.mxu0 %v5690_v47 }
 0x790   : > { %v5225_v46 = vpop.eup %5224  ;;  %4958 = vmatprep.subr.bf16.mxu0 %v5721_v58 }
 0x791   : > { %v5227_v48 = vpop.eup %5226  ;;  %4758 = vmatprep.mubr.msk.f32.mxu0 %vm2189_vm2, %v5225_v46 }
 0x792   : > { %4759 = vmatmul.mubr.msk.f32.gmra.mrb[16].mxu0 %vm2189_vm2, %v5227_v48 }
 0x793   : > { %4960 = vmatpush3.bf16.msra.mxu0 %v5721_v58 }
 0x794   : > { %4970 = vmatprep.subr.bf16.mxu0 %v5690_v47 }
 0x861   : > { %v4757_v49 = vpop.f32.mrb[14].mxu0 }
 0x862   : > { %v5045_v50 = vadd.f32 %v4757_v49, %v5773_v10  ;;  %v3099_v51 = vpop.f32.mrb[15].mxu0 }
 0x863   : > { %v5046_v52 = vadd.f32 %v5773_v10, %v3099_v51 }
 0x865   : > { %5228 = vtanh.f32 %v5046_v52  ;;  %v4760_v53 = vpop.f32.mrb[16].mxu0 }
 0x866   : > { %5230 = vtanh.f32 %v5045_v50  ;;  %v5047_v54 = vadd.f32 %v4760_v53, %v5773_v10  ;;  %v3109_v55 = vpop.f32.mrb[17].mxu0 }
 0x867   : > { %v5048_v56 = vadd.f32 %v5773_v10, %v3109_v55 }
 0x869   : > { %5232 = vtanh.f32 %v5048_v56 }
 0x86a   : > { %5234 = vtanh.f32 %v5047_v54 }
 0x86f   : > { %v5229_v57 = vpop.eup %5228 }
 0x870   : > { %v5231_v59 = vpop.eup %5230  ;;  %4769 = vmatprep.mubr.msk.f32.mxu1 %vm2189_vm2, %v5229_v57 }
 0x871   : > { %4770 = vmatmul.mubr.msk.f32.vlgmr.msra.gmra.mrb[18].mxu1 %vm2189_vm2, %v5231_v59 }
 0x872   : > { %4964 = vmatpush3.bf16.msra.mxu1 %v5690_v47 }
 0x873   : > { %v5233_v60 = vpop.eup %5232  ;;  %4966 = vmatprep.subr.bf16.mxu1 %v5721_v58 }
 0x874   : > { %v5235_v61 = vpop.eup %5234  ;;  %4772 = vmatprep.mubr.msk.f32.mxu1 %vm2189_vm2, %v5233_v60 }
 0x875   : > { %4773 = vmatmul.mubr.msk.f32.gmra.mrb[20].mxu1 %vm2189_vm2, %v5235_v61 }
 0x876   : > { %4968 = vmatpush3.bf16.msra.mxu1 %v5721_v58 }
 0x877   : > { %4978 = vmatprep.subr.bf16.mxu1 %v5690_v47 }
 0x944   : > { %v4771_v62 = vpop.f32.mrb[18].mxu1 }
 0x945   : > { %v5049_v63 = vadd.f32 %v4771_v62, %v5773_v10  ;;  %v3204_v1 = vpop.f32.mrb[19].mxu1 }
 0x946   : > { %v5050_v2 = vadd.f32 %v5773_v10, %v3204_v1 }
 0x948   : > { %5236 = vtanh.f32 %v5050_v2  ;;  %v4774_v3 = vpop.f32.mrb[20].mxu1 }
 0x949   : > { %5238 = vtanh.f32 %v5049_v63  ;;  %v5051_v4 = vadd.f32 %v4774_v3, %v5773_v10  ;;  %v3214_v5 = vpop.f32.mrb[21].mxu1 }
 0x94a   : > { %v5052_v6 = vadd.f32 %v5773_v10, %v3214_v5 }
 0x94c   : > { %5240 = vtanh.f32 %v5052_v6 }
 0x94d   : > { %5242 = vtanh.f32 %v5051_v4 }
 0x952   : > { %v5237_v0 = vpop.eup %5236 }
 0x953   : > { %v5239_v7 = vpop.eup %5238  ;;  %4783 = vmatprep.mubr.msk.f32.mxu0 %vm2189_vm2, %v5237_v0 }
 0x954   : > { %4784 = vmatmul.mubr.msk.f32.vlgmr.msra.gmra.mrb[18].mxu0 %vm2189_vm2, %v5239_v7  ;;  %v3861_v7 = vld [vmem:[%s5987_s4] sm:$0xff] }
 0x955   : > { %4972 = vmatpush3.bf16.msra.mxu0 %v5690_v47 }
 0x956   : > { %v5241_v8 = vpop.eup %5240  ;;  %4974 = vmatprep.subr.bf16.mxu0 %v5721_v58 }
 0x957   : > { %v5243_v9 = vpop.eup %5242  ;;  %4786 = vmatprep.mubr.msk.f32.mxu0 %vm2189_vm2, %v5241_v8  ;;  %v3862_v8 = vld [vmem:[%s5987_s4 + $0x8] sm:$0xff] }
 0x958   : > { %4787 = vmatmul.mubr.msk.f32.gmra.mrb[20].mxu0 %vm2189_vm2, %v5243_v9  ;;  %v5001_v9 = vpack.c.bf16 %v3862_v8, %v3861_v7 }
 0x959   : > { %4976 = vmatpush3.bf16.msra.mxu0 %v5721_v58 }
 0x95a   : > { %4986 = vmatprep.subr.bf16.mxu0 %v5690_v47 }
 0xa27   : > { %v4785_v11 = vpop.f32.mrb[18].mxu0 }
 0xa28   : > { %v5053_v12 = vadd.f32 %v4785_v11, %v5773_v10  ;;  %v3309_v13 = vpop.f32.mrb[19].mxu0  ;;  %v3863_v11 = vld [vmem:[%s5987_s4 + $0x10] sm:$0xff] }
 0xa29   : > { %v5054_v14 = vadd.f32 %v5773_v10, %v3309_v13 }
 0xa2b   : > { %5244 = vtanh.f32 %v5054_v14  ;;  %v4788_v15 = vpop.f32.mrb[20].mxu0 }
 0xa2c   : > { %5246 = vtanh.f32 %v5053_v12  ;;  %v5055_v16 = vadd.f32 %v4788_v15, %v5773_v10  ;;  %v3319_v17 = vpop.f32.mrb[21].mxu0  ;;  %v3864_v12 = vld [vmem:[%s5987_s4 + $0x18] sm:$0xff] }
 0xa2d   : > { %v5056_v18 = vadd.f32 %v5773_v10, %v3319_v17  ;;  %v5005_v13 = vpack.c.bf16 %v3864_v12, %v3863_v11 }
 0xa2f   : > { %5248 = vtanh.f32 %v5056_v18 }
 0xa30   : > { %5250 = vtanh.f32 %v5055_v16 }
 0xa35   : > { %v5245_v19 = vpop.eup %5244 }
 0xa36   : > { %v5247_v20 = vpop.eup %5246  ;;  %4797 = vmatprep.mubr.msk.f32.mxu1 %vm2189_vm2, %v5245_v19 }
 0xa37   : > { %4798 = vmatmul.mubr.msk.f32.vlgmr.msra.gmra.mrb[22].mxu1 %vm2189_vm2, %v5247_v20 }
 0xa38   : > { %4980 = vmatpush3.bf16.msra.mxu1 %v5690_v47 }
 0xa39   : > { %v5249_v21 = vpop.eup %5248  ;;  %4982 = vmatprep.subr.bf16.mxu1 %v5721_v58 }
 0xa3a   : > { %v5251_v22 = vpop.eup %5250  ;;  %4800 = vmatprep.mubr.msk.f32.mxu1 %vm2189_vm2, %v5249_v21 }
 0xa3b   : > { %4801 = vmatmul.mubr.msk.f32.gmra.mrb[24].mxu1 %vm2189_vm2, %v5251_v22 }
 0xa3c   : > { %4984 = vmatpush3.bf16.msra.mxu1 %v5721_v58 }
 0xa3d   : > { %4994 = vmatprep.subr.bf16.mxu1 %v5690_v47 }
 0xb0a   : > { %v4799_v23 = vpop.f32.mrb[22].mxu1 }
 0xb0b   : > { %v5057_v24 = vadd.f32 %v4799_v23, %v5773_v10  ;;  %v3414_v25 = vpop.f32.mrb[23].mxu1 }
 0xb0c   : > { %v5058_v26 = vadd.f32 %v5773_v10, %v3414_v25 }
 0xb0e   : > { %5252 = vtanh.f32 %v5058_v26  ;;  %v4802_v27 = vpop.f32.mrb[24].mxu1  ;;  %v4283_v26 = vld [vmem:[%s5988_s5] ss:$0 sm:$0xff] }
 0xb0f   : > { %5254 = vtanh.f32 %v5057_v24  ;;  %v5059_v28 = vadd.f32 %v4802_v27, %v5773_v10  ;;  %v3424_v29 = vpop.f32.mrb[25].mxu1 }
 0xb10   : > { %v5060_v30 = vadd.f32 %v5773_v10, %v3424_v29 }
 0xb12   : > { %5256 = vtanh.f32 %v5060_v30 }
 0xb13   : > { %5258 = vtanh.f32 %v5059_v28 }
 0xb18   : > { %v5253_v31 = vpop.eup %5252 }
 0xb19   : > { %v5255_v32 = vpop.eup %5254  ;;  %4811 = vmatprep.mubr.msk.f32.mxu0 %vm2189_vm2, %v5253_v31 }
 0xb1a   : > { %4812 = vmatmul.mubr.msk.f32.vlgmr.msra.gmra.mrb[22].mxu0 %vm2189_vm2, %v5255_v32 }
 0xb1b   : > { %4988 = vmatpush3.bf16.msra.mxu0 %v5690_v47 }
 0xb1c   : > { %v5257_v33 = vpop.eup %5256  ;;  %4990 = vmatprep.subr.bf16.mxu0 %v5721_v58 }
 0xb1d   : > { %v5259_v34 = vpop.eup %5258  ;;  %4814 = vmatprep.mubr.msk.f32.mxu0 %vm2189_vm2, %v5257_v33 }
 0xb1e   : > { %4815 = vmatmul.mubr.msk.f32.gmra.mrb[24].mxu0 %vm2189_vm2, %v5259_v34 }
 0xb1f   : > { %4992 = vmatpush3.bf16.msra.mxu0 %v5721_v58 }
 0xb20   : > { %5002 = vmatprep.subr.bf16.mxu0 %v5001_v9 }
 0xbed   : > { %v4813_v35 = vpop.f32.mrb[22].mxu0 }
 0xbee   : > { %v5061_v36 = vadd.f32 %v4813_v35, %v5773_v10  ;;  %v3519_v37 = vpop.f32.mrb[23].mxu0 }
 0xbef   : > { %v5062_v38 = vadd.f32 %v5773_v10, %v3519_v37 }
 0xbf1   : > { %5260 = vtanh.f32 %v5062_v38  ;;  %v4816_v39 = vpop.f32.mrb[24].mxu0 }
 0xbf2   : > { %5262 = vtanh.f32 %v5061_v36  ;;  %v5063_v40 = vadd.f32 %v4816_v39, %v5773_v10  ;;  %v3529_v41 = vpop.f32.mrb[25].mxu0 }
 0xbf3   : > { %v5064_v42 = vadd.f32 %v5773_v10, %v3529_v41 }
 0xbf5   : > { %5264 = vtanh.f32 %v5064_v42 }
 0xbf6   : > { %5266 = vtanh.f32 %v5063_v40 }
 0xbfb   : > { %v5261_v43 = vpop.eup %5260 }
 0xbfc   : > { %v5263_v44 = vpop.eup %5262  ;;  %4825 = vmatprep.mubr.msk.f32.mxu1 %vm2189_vm2, %v5261_v43 }
 0xbfd   : > { %4826 = vmatmul.mubr.msk.f32.vlgmr.msra.gmra.mrb[26].mxu1 %vm2189_vm2, %v5263_v44 }
 0xbfe   : > { %4996 = vmatpush3.bf16.msra.mxu1 %v5690_v47 }
 0xbff   : > { %v5265_v45 = vpop.eup %5264  ;;  %4998 = vmatprep.subr.bf16.mxu1 %v5721_v58 }
 0xc00   : > { %v5267_v46 = vpop.eup %5266  ;;  %4828 = vmatprep.mubr.msk.f32.mxu1 %vm2189_vm2, %v5265_v45 }
 0xc01   : > { %4829 = vmatmul.mubr.msk.f32.gmra.mrb[28].mxu1 %vm2189_vm2, %v5267_v46 }
 0xc02   : > { %5000 = vmatpush3.bf16.msra.mxu1 %v5721_v58 }
 0xcd0   : > { %v4827_v48 = vpop.f32.mrb[26].mxu1 }
 0xcd1   : > { %v5065_v49 = vadd.f32 %v4827_v48, %v5773_v10  ;;  %v3624_v50 = vpop.f32.mrb[27].mxu1 }
 0xcd2   : > { %v5066_v51 = vadd.f32 %v5773_v10, %v3624_v50 }
 0xcd4   : > { %5268 = vtanh.f32 %v5066_v51  ;;  %v4830_v52 = vpop.f32.mrb[28].mxu1 }
 0xcd5   : > { %5270 = vtanh.f32 %v5065_v49  ;;  %v5067_v47 = vadd.f32 %v4830_v52, %v5773_v10  ;;  %v3634_v53 = vpop.f32.mrb[29].mxu1 }
 0xcd6   : > { %v5068_v54 = vadd.f32 %v5773_v10, %v3634_v53 }
 0xcd8   : > { %5272 = vtanh.f32 %v5068_v54 }
 0xcd9   : > { %5274 = vtanh.f32 %v5067_v47 }
 0xcde   : > { %v5269_v55 = vpop.eup %5268 }
 0xcdf   : > { %v5271_v56 = vpop.eup %5270  ;;  %4839 = vmatprep.mubr.msk.f32.mxu0 %vm2189_vm2, %v5269_v55 }
 0xce0   : > { %4840 = vmatmul.mubr.msk.f32.vlgmr.msra.gmra.mrb[26].mxu0 %vm2189_vm2, %v5271_v56 }
 0xce1   : > { %5004 = vmatpush3.bf16.msra.mxu0 %v5001_v9 }
 0xce2   : > { %v5273_v58 = vpop.eup %5272  ;;  %5006 = vmatprep.subr.bf16.mxu0 %v5005_v13 }
 0xce3   : > { %v5275_v57 = vpop.eup %5274  ;;  %4842 = vmatprep.mubr.msk.f32.mxu0 %vm2189_vm2, %v5273_v58 }
 0xce4   : > { %4843 = vmatmul.mubr.msk.f32.gmra.mrb[28].mxu0 %vm2189_vm2, %v5275_v57 }
 0xce5   : > { %5008 = vmatpush3.bf16.msra.mxu0 %v5005_v13 }
 0xdb3   : > { %v4841_v59 = vpop.f32.mrb[26].mxu0 }
 0xdb4   : > { %v5069_v60 = vadd.f32 %v4841_v59, %v5773_v10  ;;  %v3729_v61 = vpop.f32.mrb[27].mxu0 }
 0xdb5   : > { %v5070_v62 = vadd.f32 %v5773_v10, %v3729_v61 }
 0xdb7   : > { %5276 = vtanh.f32 %v5070_v62  ;;  %v4844_v63 = vpop.f32.mrb[28].mxu0 }
 0xdb8   : > { %5278 = vtanh.f32 %v5069_v60  ;;  %v5071_v1 = vadd.f32 %v4844_v63, %v5773_v10  ;;  %v3739_v2 = vpop.f32.mrb[29].mxu0 }
 0xdb9   : > { %v5072_v3 = vadd.f32 %v5773_v10, %v3739_v2 }
 0xdbb   : > { %5280 = vtanh.f32 %v5072_v3 }
 0xdbc   : > { %5282 = vtanh.f32 %v5071_v1 }
 0xdc1   : > { %v5277_v4 = vpop.eup %5276 }
 0xdc2   : > { %v5279_v5 = vpop.eup %5278  ;;  %4853 = vmatprep.mubr.msk.f32.mxu1 %vm2189_vm2, %v5277_v4 }
 0xdc3   : > { %4854 = vmatmul.mubr.msk.f32.vlgmr.msra.gmra.mrb[30].mxu1 %vm2189_vm2, %v5279_v5 }
 0xdc5   : > { %v5281_v6 = vpop.eup %5280 }
 0xdc6   : > { %v5283_v0 = vpop.eup %5282  ;;  %4856 = vmatprep.mubr.msk.f32.mxu1 %vm2189_vm2, %v5281_v6 }
 0xdc7   : > { %4857 = vmatmul.mubr.msk.f32.gmra.mrb[32].mxu1 %vm2189_vm2, %v5283_v0 }
 0xe96   : > { %v4855_v14 = vpop.f32.mrb[30].mxu1 }
 0xe97   : > { %v5073_v15 = vadd.f32 %v4855_v14, %v5773_v10  ;;  %v3834_v16 = vpop.f32.mrb[31].mxu1 }
 0xe98   : > { %v5074_v17 = vadd.f32 %v5773_v10, %v3834_v16 }
 0xe9a   : > { %5284 = vtanh.f32 %v5074_v17  ;;  %v4858_v18 = vpop.f32.mrb[32].mxu1 }
 0xe9b   : > { %5286 = vtanh.f32 %v5073_v15  ;;  %v5075_v19 = vadd.f32 %v4858_v18, %v5773_v10  ;;  %v3844_v20 = vpop.f32.mrb[33].mxu1 }
 0xe9c   : > { %v5076_v21 = vadd.f32 %v5773_v10, %v3844_v20 }
 0xe9e   : > { %5288 = vtanh.f32 %v5076_v21 }
 0xe9f   : > { %5290 = vtanh.f32 %v5075_v19 }
 0xea4   : > { %v5285_v22 = vpop.eup %5284 }
 0xea5   : > { %v5287_v23 = vpop.eup %5286  ;;  %4867 = vmatprep.mubr.msk.f32.mxu0 %vm2189_vm2, %v5285_v22 }
 0xea6   : > { %4868 = vmatmul.mubr.msk.f32.vlgmr.msra.gmra.mrb[32].mxu0 %vm2189_vm2, %v5287_v23 }
 0xea8   : > { %v5289_v24 = vpop.eup %5288 }
 0xea9   : > { %v5291_v25 = vpop.eup %5290  ;;  %4870 = vmatprep.mubr.msk.f32.mxu0 %vm2189_vm2, %v5289_v24 }
 0xeaa   : > { %4871 = vmatmul.mubr.msk.f32.gmra.mrb[34].mxu0 %vm2189_vm2, %v5291_v25 }
 0xf79   : > { %v4869_v27 = vpop.f32.mrb[32].mxu0 }
 0xf7a   : > { %v3950_v10 = vpop.f32.mrb[33].mxu0  ;;  %v3956_v31 = vadd.f32 %v4869_v27, %v4283_v26 }
 0xf7b   : > { %v3951_v28 = vadd.f32 %v4283_v26, %v3950_v10 }
 0xf7d   : > { %3969 = vmax.xlane.f32.xlu0 %v3951_v28  ;;  %v4872_v29 = vpop.f32.mrb[34].mxu0 }
 0xf7e   : > { %v3960_v30 = vpop.f32.mrb[35].mxu0  ;;  %v3966_v33 = vadd.f32 %v4872_v29, %v4283_v26 }
 0xf7f   : > { %v3961_v32 = vadd.f32 %v4283_v26, %v3960_v30 }
 0xf81   : > { %3971 = vmax.xlane.f32.xlu0 %v3956_v31  ;;  %3973 = vmax.xlane.f32.xlu1 %v3961_v32 }
 0xf85   : > { %3975 = vmax.xlane.f32.xlu1 %v3966_v33 }
0x100a   : > { %v3970_v34 = vpop.xlane.xlu0 %3969 }
0x100b   : > { %v3977_v35 = vsub.f32 %v3951_v28, %v3970_v34 }
0x100d   : > { %v3981_v36 = vmul.f32 1.442695, %v3977_v35 }
0x100e   : > { %v3972_v37 = vpop.xlane.xlu0 %3971  ;;  %v3974_v38 = vpop.xlane.xlu1 %3973 }
0x100f   : > { %5292 = vpow2.f32 %v3981_v36  ;;  %v3978_v39 = vsub.f32 %v3956_v31, %v3972_v37  ;;  %v3979_v40 = vsub.f32 %v3961_v32, %v3974_v38 }
0x1011   : > { %v3983_v41 = vmul.f32 1.442695, %v3978_v39  ;;  %v3985_v42 = vmul.f32 1.442695, %v3979_v40 }
0x1012   : > { %v3976_v43 = vpop.xlane.xlu1 %3975 }
0x1013   : > { %5294 = vpow2.f32 %v3983_v41  ;;  %v3980_v44 = vsub.f32 %v3966_v33, %v3976_v43 }
0x1014   : > { %5296 = vpow2.f32 %v3985_v42 }
0x1015   : > { %v3987_v45 = vmul.f32 1.442695, %v3980_v44 }
0x1017   : > { %5298 = vpow2.f32 %v3987_v45 }
0x1019   : > { %v5293_v46 = vpop.eup %5292 }
0x101a   : > { %3989 = vadd.xlane.f32.xlu0 %v5293_v46 }
0x101d   : > { %v5295_v48 = vpop.eup %5294 }
0x101e   : > { %v5297_v49 = vpop.eup %5296  ;;  %3991 = vadd.xlane.f32.xlu1 %v5295_v48 }
0x101f   : > { %3993 = vadd.xlane.f32.xlu0 %v5297_v49 }
0x1021   : > { %v5299_v50 = vpop.eup %5298 }
0x1022   : > { %3995 = vadd.xlane.f32.xlu1 %v5299_v50 }
0x10a7   : > { %v3990_v51 = vpop.xlane.xlu0 %3989 }
0x10a8   : > { %5300 = vrcp.f32 %v3990_v51 }
0x10ab   : > { %v3992_v52 = vpop.xlane.xlu1 %3991 }
0x10ac   : > { %v3994_v47 = vpop.xlane.xlu0 %3993  ;;  %5302 = vrcp.f32 %v3992_v52 }
0x10ad   : > { %5304 = vrcp.f32 %v3994_v47 }
0x10af   : > { %v3996_v53 = vpop.xlane.xlu1 %3995 }
0x10b0   : > { %5306 = vrcp.f32 %v3996_v53 }
0x10b2   : > { %v5301_v54 = vpop.eup %5300 }
0x10b3   : > { %v4001_v55 = vmul.f32 %v5301_v54, %v5293_v46 }
0x10b5   : > { %4005 = vst [vmem:[%s539_s26] sm:$0xff] %v4001_v55 }
0x10b6   : > { %v5303_v56 = vpop.eup %5302 }
0x10b7   : > { %v5305_v58 = vpop.eup %5304  ;;  %v4002_v57 = vmul.f32 %v5303_v56, %v5295_v48 }
0x10b8   : > { %v4003_v59 = vmul.f32 %v5305_v58, %v5297_v49 }
0x10b9   : > { %4006 = vst [vmem:[%s539_s26 + $0x8] sm:$0xff] %v4002_v57 }
0x10ba   : > { %v5307_v60 = vpop.eup %5306  ;;  %4007 = vst [vmem:[%s539_s26 + $0x10] sm:$0xff] %v4003_v59 }
0x10bb   : > { %v4004_v61 = vmul.f32 %v5307_v60, %v5299_v50 }
0x10bd   : > { %4008 = vst [vmem:[%s539_s26 + $0x18] sm:$0xff] %v4004_v61 }
0x10be PF: > { %p13_p9 = scmp.ge.s32.totalorder %s5385_s25, 4   ;;  %s5990_s21 = smov %s5326_s22 }
0x10bf   : > { %s5991_s22 = smov %s5394_s28  ;;  %s5992_s23 = smov %s5385_s25 }
0x10c0   :  { %15 = sbr.rel (!%p13_p9) target bundleno = 2 (0x2), region = 132 }

</bundles_post_ra>
